<compile_context>
chip_gen: v5e
topology: v5e:2x2
jax: 0.10.0
libtpu: 0.0.40
codegen_flags: <defaults>
</compile_context>

<pallas_src>
import jax
import jax.numpy as jnp
from jax.experimental import pallas as pl
from jax.experimental.pallas import tpu as pltpu


def _make_conv3x3_kernel(H, W, Cin, Cout):
    HW = H * W

    def kernel(x_ref, w_ref, b_ref, o_ref, xp_ref):
        # x_ref : (1, Cin, H, W)     one batch element, NCHW exactly as PyTorch supplies it
        # w_ref : (Cout, 9*Cin)      weights, (kh, kw, cin) flattened along axis 1
        # b_ref : (Cout, 1)          bias
        # o_ref : (1, Cout, H*W)     lane-dense output block (last dim multiple of 128)
        # xp_ref: (Cin, H+2, W+2)    VMEM scratch holding the zero-padded image

        # In-kernel zero padding (replaces the wrapper-side jnp.pad HBM round trip).
        xp_ref[...] = jnp.zeros_like(xp_ref)
        xp_ref[:, 1:H + 1, 1:W + 1] = x_ref[0]

        # im2col: build the (9*Cin, H*W) patch matrix once in VMEM ...
        taps = []
        for kh in range(3):
            for kw in range(3):
                taps.append(xp_ref[:, kh:kh + H, kw:kw + W].reshape(Cin, HW))
        patch = jnp.concatenate(taps, axis=0)                      # (9*Cin, H*W)

        # ... and do a single MXU matmul with K = 9*Cin (not 9 tiny K=Cin dots).
        acc = jnp.dot(w_ref[...], patch,
                      preferred_element_type=jnp.float32)          # (Cout, H*W)
        acc = acc + b_ref[...].astype(jnp.float32)                 # bias broadcast over lanes
        o_ref[0] = acc.astype(o_ref.dtype)

    return kernel


def out_forward(x_nchw, weight_oihw, bias):
    """Forward pass of `Out`.

    x_nchw:      (N, Cin, H, W)    float32 (PyTorch NCHW)
    weight_oihw: (Cout, Cin, 3, 3) float32 (PyTorch OIHW)
    bias:        (Cout,)           float32
    returns:     (N, Cout, H, W)   float32
    """
    N, Cin, H, W = x_nchw.shape
    Cout = weight_oihw.shape[0]
    HW = H * W

    # Only the (tiny) parameters are reshuffled on the host side; activations
    # go to / come from the kernel without any extra HBM passes.
    #   (Cout, Cin, kh, kw) -> (Cout, kh, kw, Cin) -> (Cout, 9*Cin)
    w2 = jnp.transpose(weight_oihw, (0, 2, 3, 1)).reshape(Cout, 9 * Cin)
    b2 = bias.reshape(Cout, 1)

    kernel = _make_conv3x3_kernel(H, W, Cin, Cout)

    out_flat = pl.pallas_call(
        kernel,
        out_shape=jax.ShapeDtypeStruct((N, Cout, HW), x_nchw.dtype),
        grid_spec=pltpu.PrefetchScalarGridSpec(
            num_scalar_prefetch=0,
            grid=(N,),
            in_specs=[
                pl.BlockSpec((1, Cin, H, W), lambda n: (n, 0, 0, 0)),
                pl.BlockSpec((Cout, 9 * Cin), lambda n: (0, 0)),
                pl.BlockSpec((Cout, 1), lambda n: (0, 0)),
            ],
            out_specs=pl.BlockSpec((1, Cout, HW), lambda n: (n, 0, 0)),
            scratch_shapes=[pltpu.VMEM((Cin, H + 2, W + 2), x_nchw.dtype)],
        ),
        compiler_params=pltpu.CompilerParams(
            dimension_semantics=("parallel",),
        ),
    )(x_nchw, w2, b2)

    # (N, Cout, H*W) -> (N, Cout, H, W): contiguous metadata reshape, no HBM copy.
    return out_flat.reshape(N, Cout, H, W)


def _reference_conv(x_nchw, weight_oihw, bias):
    out = jax.lax.conv_general_dilated(
        x_nchw, weight_oihw,
        window_strides=(1, 1),
        padding=((1, 1), (1, 1)),
        dimension_numbers=("NCHW", "OIHW", "NCHW"),
    )
    return out + bias.reshape(1, -1, 1, 1)


if __name__ == "__main__":
    # Small shapes consistent with the module: batch=2, in_channels=4,
    # spatial=16x16, num_classes=8.
    N, Cin, H, W, Cout = 2, 4, 16, 16, 8

    key = jax.random.PRNGKey(0)
    k_x, k_w, k_b = jax.random.split(key, 3)
    x = jax.random.normal(k_x, (N, Cin, H, W), dtype=jnp.float32)
    fan_in = Cin * 3 * 3
    bound = 1.0 / (fan_in ** 0.5)
    weight = jax.random.uniform(k_w, (Cout, Cin, 3, 3), jnp.float32, -bound, bound)
    bias = jax.random.uniform(k_b, (Cout,), jnp.float32, -bound, bound)

    out = out_forward(x, weight, bias)
    jax.block_until_ready(out)

    ref = _reference_conv(x, weight, bias)
    assert out.shape == (N, Cout, H, W)
    assert jnp.allclose(out, ref, atol=1e-4, rtol=1e-4)

    print("KERNEL_OK")
</pallas_src>

<mosaic_0001>
module attributes {stable_mosaic.version = 11 : i64} {
  func.func @kernel(%arg0: i32, %arg1: memref<1x4x16x16xf32, #tpu.memory_space<vmem>>, %arg2: memref<8x36xf32, #tpu.memory_space<vmem>>, %arg3: memref<8x1xf32, #tpu.memory_space<vmem>>, %arg4: memref<1x8x256xf32, #tpu.memory_space<vmem>>, %arg5: memref<4x18x18xf32, #tpu.memory_space<vmem>>) attributes {dimension_semantics = [#tpu.dimension_semantics<parallel>], iteration_bounds = array<i64: 2>, scalar_prefetch = 0 : i64, scratch_operands = 1 : i64, tpu.core_type = #tpu.core_type<tc>, window_params = [{transform_indices = @transform_0, window_bounds = array<i64: 1, 4, 16, 16>}, {pipeline_mode = #tpu.pipeline_mode<synchronous>, transform_indices = @transform_1, window_bounds = array<i64: 8, 36>}, {pipeline_mode = #tpu.pipeline_mode<synchronous>, transform_indices = @transform_2, window_bounds = array<i64: 8, 1>}, {transform_indices = @transform_3, window_bounds = array<i64: 1, 8, 256>}]} {
    %cst = arith.constant 0.000000e+00 : f32
    %0 = vector.broadcast %cst : f32 to vector<4x18x18xf32>
    %c0 = arith.constant 0 : index
    %c0_0 = arith.constant 0 : index
    %c0_1 = arith.constant 0 : index
    %1 = vector.load %arg5[%c0, %c0_0, %c0_1] : memref<4x18x18xf32, #tpu.memory_space<vmem>>, vector<4x18x18xf32>
    tpu.vector_store %arg5[%c0, %c0_0, %c0_1], %0 {strides = array<i32>} : memref<4x18x18xf32, #tpu.memory_space<vmem>>, vector<4x18x18xf32>,
    %c0_2 = arith.constant 0 : index
    %c0_3 = arith.constant 0 : index
    %c0_4 = arith.constant 0 : index
    %c0_5 = arith.constant 0 : index
    %2 = vector.load %arg1[%c0_2, %c0_3, %c0_4, %c0_5] : memref<1x4x16x16xf32, #tpu.memory_space<vmem>>, vector<1x4x16x16xf32>
    %3 = vector.shape_cast %2 : vector<1x4x16x16xf32> to vector<4x16x16xf32>
    %c0_6 = arith.constant 0 : index
    %c1 = arith.constant 1 : index
    %c1_7 = arith.constant 1 : index
    %4 = vector.load %arg5[%c0_6, %c1, %c1_7] : memref<4x18x18xf32, #tpu.memory_space<vmem>>, vector<4x16x16xf32>
    tpu.vector_store %arg5[%c0_6, %c1, %c1_7], %3 {strides = array<i32>} : memref<4x18x18xf32, #tpu.memory_space<vmem>>, vector<4x16x16xf32>,
    %c0_8 = arith.constant 0 : index
    %c0_9 = arith.constant 0 : index
    %c0_10 = arith.constant 0 : index
    %5 = vector.load %arg5[%c0_8, %c0_9, %c0_10] : memref<4x18x18xf32, #tpu.memory_space<vmem>>, vector<4x16x16xf32>
    %6 = vector.shape_cast %5 : vector<4x16x16xf32> to vector<4x256xf32>
    %c0_11 = arith.constant 0 : index
    %c0_12 = arith.constant 0 : index
    %c1_13 = arith.constant 1 : index
    %7 = vector.load %arg5[%c0_11, %c0_12, %c1_13] : memref<4x18x18xf32, #tpu.memory_space<vmem>>, vector<4x16x16xf32>
    %8 = vector.shape_cast %7 : vector<4x16x16xf32> to vector<4x256xf32>
    %c0_14 = arith.constant 0 : index
    %c0_15 = arith.constant 0 : index
    %c2 = arith.constant 2 : index
    %9 = vector.load %arg5[%c0_14, %c0_15, %c2] : memref<4x18x18xf32, #tpu.memory_space<vmem>>, vector<4x16x16xf32>
    %10 = vector.shape_cast %9 : vector<4x16x16xf32> to vector<4x256xf32>
    %c0_16 = arith.constant 0 : index
    %c1_17 = arith.constant 1 : index
    %c0_18 = arith.constant 0 : index
    %11 = vector.load %arg5[%c0_16, %c1_17, %c0_18] : memref<4x18x18xf32, #tpu.memory_space<vmem>>, vector<4x16x16xf32>
    %12 = vector.shape_cast %11 : vector<4x16x16xf32> to vector<4x256xf32>
    %c0_19 = arith.constant 0 : index
    %c1_20 = arith.constant 1 : index
    %c1_21 = arith.constant 1 : index
    %13 = vector.load %arg5[%c0_19, %c1_20, %c1_21] : memref<4x18x18xf32, #tpu.memory_space<vmem>>, vector<4x16x16xf32>
    %14 = vector.shape_cast %13 : vector<4x16x16xf32> to vector<4x256xf32>
    %c0_22 = arith.constant 0 : index
    %c1_23 = arith.constant 1 : index
    %c2_24 = arith.constant 2 : index
    %15 = vector.load %arg5[%c0_22, %c1_23, %c2_24] : memref<4x18x18xf32, #tpu.memory_space<vmem>>, vector<4x16x16xf32>
    %16 = vector.shape_cast %15 : vector<4x16x16xf32> to vector<4x256xf32>
    %c0_25 = arith.constant 0 : index
    %c2_26 = arith.constant 2 : index
    %c0_27 = arith.constant 0 : index
    %17 = vector.load %arg5[%c0_25, %c2_26, %c0_27] : memref<4x18x18xf32, #tpu.memory_space<vmem>>, vector<4x16x16xf32>
    %18 = vector.shape_cast %17 : vector<4x16x16xf32> to vector<4x256xf32>
    %c0_28 = arith.constant 0 : index
    %c2_29 = arith.constant 2 : index
    %c1_30 = arith.constant 1 : index
    %19 = vector.load %arg5[%c0_28, %c2_29, %c1_30] : memref<4x18x18xf32, #tpu.memory_space<vmem>>, vector<4x16x16xf32>
    %20 = vector.shape_cast %19 : vector<4x16x16xf32> to vector<4x256xf32>
    %c0_31 = arith.constant 0 : index
    %c2_32 = arith.constant 2 : index
    %c2_33 = arith.constant 2 : index
    %21 = vector.load %arg5[%c0_31, %c2_32, %c2_33] : memref<4x18x18xf32, #tpu.memory_space<vmem>>, vector<4x16x16xf32>
    %22 = vector.shape_cast %21 : vector<4x16x16xf32> to vector<4x256xf32>
    %23 = tpu.concatenate %6, %8, %10, %12, %14, %16, %18, %20, %22 in 0 : vector<4x256xf32>, vector<4x256xf32>, vector<4x256xf32>, vector<4x256xf32>, vector<4x256xf32>, vector<4x256xf32>, vector<4x256xf32>, vector<4x256xf32>, vector<4x256xf32> -> vector<36x256xf32>
    %c0_34 = arith.constant 0 : index
    %c0_35 = arith.constant 0 : index
    %24 = vector.load %arg2[%c0_34, %c0_35] : memref<8x36xf32, #tpu.memory_space<vmem>>, vector<8x36xf32>
    %cst_36 = arith.constant dense<0.000000e+00> : vector<8x256xf32>
    %25 = tpu.matmul %24, %23, %cst_36 {dimension_numbers = #tpu.dot_dimension_numbers<[1], [0], [0], [1], [0, 0, 1, 1], [], []>} : vector<8x36xf32>, vector<36x256xf32>, vector<8x256xf32> -> vector<8x256xf32>
    %c0_37 = arith.constant 0 : index
    %c0_38 = arith.constant 0 : index
    %26 = vector.load %arg3[%c0_37, %c0_38] : memref<8x1xf32, #tpu.memory_space<vmem>>, vector<8x1xf32>
    %27 = vector.broadcast %26 : vector<8x1xf32> to vector<8x256xf32>
    %28 = arith.addf %25, %27 : vector<8x256xf32>
    %c0_39 = arith.constant 0 : index
    %c0_40 = arith.constant 0 : index
    %c0_41 = arith.constant 0 : index
    %29 = vector.load %arg4[%c0_39, %c0_40, %c0_41] : memref<1x8x256xf32, #tpu.memory_space<vmem>>, vector<1x8x256xf32>
    %30 = vector.shape_cast %29 : vector<1x8x256xf32> to vector<8x256xf32>
    %31 = vector.shape_cast %28 : vector<8x256xf32> to vector<1x8x256xf32>
    tpu.vector_store %arg4[%c0_39, %c0_40, %c0_41], %31 {strides = array<i32>} : memref<1x8x256xf32, #tpu.memory_space<vmem>>, vector<1x8x256xf32>,
    return
  }
  func.func @transform_0(%arg0: i32) -> (i32, i32, i32, i32) {
    %c0_i32 = arith.constant 0 : i32
    %c0_i32_0 = arith.constant 0 : i32
    %c0_i32_1 = arith.constant 0 : i32
    %c0_i32_2 = arith.constant 0 : i32
    return %arg0, %c0_i32, %c0_i32_0, %c0_i32_1 : i32, i32, i32, i32
  }
  func.func @transform_1(%arg0: i32) -> (i32, i32) {
    %c0_i32 = arith.constant 0 : i32
    %c0_i32_0 = arith.constant 0 : i32
    %c0_i32_1 = arith.constant 0 : i32
    return %c0_i32, %c0_i32_0 : i32, i32
  }
  func.func @transform_2(%arg0: i32) -> (i32, i32) {
    %c0_i32 = arith.constant 0 : i32
    %c0_i32_0 = arith.constant 0 : i32
    %c0_i32_1 = arith.constant 0 : i32
    return %c0_i32, %c0_i32_0 : i32, i32
  }
  func.func @transform_3(%arg0: i32) -> (i32, i32, i32) {
    %c0_i32 = arith.constant 0 : i32
    %c0_i32_0 = arith.constant 0 : i32
    %c0_i32_1 = arith.constant 0 : i32
    return %arg0, %c0_i32, %c0_i32_0 : i32, i32, i32
  }
}

</mosaic_0001>

<bundles_post_ra>
// kernel: tpu_custom_call.1
= control target key start
LH: loop header
LB: loop body
LE: loop exit
PB: predicated region body
PF: predicated region fallthrough
CT: control target
= control target key end

     0   :  { %8 = vsyncpa [#allocation4], 0  ;;  %s4700_s0 = inlined_call_operand.hbm [shape: f32[2,4,16,16], index: 0, kind: input, shape index: {}]   ;;  %s4701_s1 = inlined_call_operand.vmem [shape: f32[8,36], index: 1, kind: input, shape index: {}]   ;;  %s4702_s2 = inlined_call_operand.vmem [shape: f32[8,1], index: 2, kind: input, shape index: {}]   ;;  %s4703_s3 = inlined_call_operand.hbm [shape: f32[2,8,256], index: 3, kind: output, shape index: {}]  }
   0x1   :  { %10 = vsyncpa [#allocation4 + $0x1], 0 }
   0x2   :  { %11 = vsyncpa [#allocation5], 0 }
   0x3   :  { %13 = vsyncpa [#allocation5 + $0x1], 0  ;;  %s2869_s12 = smov 0   ;;  %s2871_s13 = smov 0  }
   0x4   :  { %s2873_s14 = smov 0   ;;  %s2875_s15 = smov 0  }
   0x5 LB: > { %s2890_s16 = sadd.s32 4294967295, %s2831_s15   ;;  %s2271_s17 = sadd.s32 4294967294, %s2831_s15   ;;  %s2831_s15 = sphi %s2875_s15, %s4841_s15   ;;  %s2827_s14 = sphi %s2873_s14, %s4840_s14   ;;  %s2823_s13 = sphi %s2871_s13, %s4839_s13   ;;  %s2819_s12 = sphi %s2869_s12, %s4838_s12  }
   0x6   : > { %s2894_s18 = sadd.s32 1, %s2831_s15   ;;  %s26_s19 = sadd.s32 1, %s2827_s14 }
   0x7   : > { %s23_s20 = ssub.s32 %s2831_s15, %s2894_s18  ;;  %p33_p0 = scmp.ne.s32.totalorder %s2827_s14, %s2823_s13 }
   0x8   : > { %p24_p1 = scmp.eq.s32.totalorder %s23_s20, 0  ;;  %p34_p2 = scmp.eq.s32.totalorder %s2831_s15, 0 }
   0x9   : > { %p39_p3 = scmp.ne.s32.totalorder %s2823_s13, %s2819_s12  ;;  %p40_p4 = scmp.eq.s32.totalorder %s2890_s16, 0 }
   0xa   : > { %s2906_s21 = scalar_select %p24_p1, %s2827_s14, %s26_s19  }
   0xb   : > { %p2908_p5 = por %p34_p2, %p33_p0  ;;  %p2912_p6 = por %p40_p4, %p39_p3 }
   0xc   : > { %p105_p7 = scmp.eq.s32.totalorder %s2890_s16, 1  ;;  %p111_p8 = scmp.eq.s32.totalorder %s2271_s17, 1 }
   0xd   : > { %p2303_p10 = scmp.lt.s32.totalorder %s2831_s15, 2  ;;  %s137_s26 = sand.u32 1, %s2827_s14  }
   0xe   : > { %p2919_p11 = por %p105_p7, %p33_p0  ;;  %p2923_p12 = por %p111_p8, %p39_p3 }
   0xf   : > { %s2289_s27 = sshll.u32 %s2831_s15, 6  ;;  %s2274_s28 = sshll.u32 %s137_s26, 6 }
  0x10   : > { %s146_s4 = scalar_lea.hbm %s4700_s0, %s2289_s27  ;;  %s141_s6 = scalar_lea.vmem [#allocation3], %s2274_s28 }
  0x11   : > { %s147_s5 = sshll.u32 %s146_s4, 4  ;;  %s149_s7 = sshll.u32 %s141_s6, 4  ;;  %s148_s5 = int_to_ptr.hbm [resolvable:$true] %s147_s5  ;;  %s150_s7 = int_to_ptr.vmem [resolvable:$true] %s149_s7 }
  0x12   : > { %p2934_p13 = pnand %p2303_p10, %p2908_p5  ;;  %p2277_p0 = scmp.ge.s32.totalorder %s2831_s15, 1 }
  0x13   : > { %p157_p1 = scmp.lt.s32.totalorder %s2831_s15, 3  ;;  %s138_s9 = scalar_lea.sflag [#allocation4], %s137_s26 }
  0x14   : > { %s2735_s10 = sshra.s32 %s148_s5, 4  ;;  %p2739_p3 = pneg %p2934_p13  ;;  %s2736_s10 = int_to_ptr.hbm [resolvable:$true] %s2735_s10 }
  0x15   : > { %s2737_s11 = scalar_lea.hbm %s2736_s10, 64  ;;  %s2742_s20 = scalar_lea.hbm %s4700_s0, 128 }
  0x16   : > { %p2738_p2 = scmp.ne.s32.totalorder %s2736_s10, %s2737_s11  ;;  %p2743_p5 = scmp.lt.s32.totalorder %s2736_s10, %s4700_s0 }
  0x17   : > { %p2744_p8 = scmp.lt.s32.totalorder %s2742_s20, %s2737_s11 }
  0x18   : > { %p2740_p4 = pnand %p2739_p3, %p2738_p2 }
  0x19   : > { %p2745_p10 = por %p2744_p8, %p2743_p5 }
  0x1a   : > { %p2741_p7 = pneg %p2740_p4 }
  0x1c   : > { %p2746_p9 = pnand %p2745_p10, %p2741_p7 }
  0x1e   : > { %2749 = shalt.err (!%p2746_p9)
}
  0x1f   : > { %s2833_s26 = smov 128   ;;  %s2834_s28 = smov 8  }
  0x20   : > { %2298 = dma.hbm_to_vmem [thread:$0]  (!%p2934_p13), %s148_s5, 1024, %s150_s7, %s138_s9, %s2833_s26, %s2833_s26, %s2834_s28  }
  0x21   : > { %p158_p2 = pnand %p2277_p0, %p157_p1 }
  0x23   : > { %161 = sbr.rel (%p158_p2) target bundleno = 732 (0x2dc), region = 32 }
  0x28   : > { %s2955_s29 = sand.u32 1, %s2823_s13  }
  0x29   : > { %s2278_s30 = sshll.u32 %s2955_s29, 6  ;;  %s164_s4 = scalar_lea.sflag [#allocation4], %s2955_s29 }
  0x2a   : > { %s167_s6 = scalar_lea.vmem [#allocation3], %s2278_s30 }
  0x2b   : > { %2810 = dma.done.wait (%p2912_p6), %s164_s4, 1024  }
  0x2c   : > { %2812 = vsyncadd (%p2912_p6), %s164_s4, 4294966272  ;;  %vm191_vm0 = vcmask 146432   ;;  %v2835_v0 = vmov 0.0   ;;  %v207_v1 = vld [vmem:[%s167_s6 + $0x10] sm:$0xff]  ;;  %v205_v2 = vld [vmem:[%s167_s6] sm:$0xff]  ;;  %s2836_s5 = smov 1  }
  0x2d   : > { %199 = vst.msk [vmem:[#allocation2 + $0x30] sm:$0xff] %vm191_vm0, %v2835_v0  ;;  %225 = vrot.lane.b32.xlu1 %v207_v1, %s2836_s5  ;;  %221 = vrot.lane.b32.xlu0 %v205_v2, %s2836_s5  ;;  %v209_v3 = vld [vmem:[%s167_s6 + $0x20] sm:$0xff]  ;;  %v208_v4 = vld [vmem:[%s167_s6 + $0x18] sm:$0xff]  ;;  %vm194_vm1 = vcmask 140288   ;;  %vm245_vm2 = vcmask 138248   ;;  %s2837_s23 = smov 127  }
  0x2e   : > { %200 = vst.msk [vmem:[#allocation2 + $0x38] sm:$0xff] %vm191_vm0, %v2835_v0  ;;  %229 = vrot.lane.b32.xlu2 %v209_v3, %s2836_s5  ;;  %v206_v5 = vld [vmem:[%s167_s6 + $0x8] sm:$0xff]  ;;  %v212_v7 = vld [vmem:[%s167_s6 + $0x38] sm:$0xff]  ;;  %v211_v8 = vld [vmem:[%s167_s6 + $0x30] sm:$0xff]  ;;  %vm263_vm3 = vcmask 1047556   ;;  %s2839_s7 = smov 126  }
  0x2f   : > { %192 = vst.msk [vmem:[#allocation2] sm:$0xff] %vm191_vm0, %v2835_v0  ;;  %v210_v6 = vld [vmem:[%s167_s6 + $0x28] sm:$0xff]  ;;  %v2838_v28 = vmov 1983009808   ;;  %v2840_v42 = vmov 1934713408  }
  0x30   : > { %193 = vst.msk [vmem:[#allocation2 + $0x8] sm:$0xff] %vm191_vm0, %v2835_v0  ;;  %v268_v29 = vunpack.c.l.s4 %v2838_v28  ;;  %v292_v43 = vunpack.c.l.s4 %v2840_v42  ;;  %s2841_s8 = smov 96   ;;  %s2842_s9 = smov 64   ;;  %vm431_vm4 = vcmask 130048   ;;  %vm433_vm5 = vcmask 261120  }
  0x31   : > { %196 = vst.msk [vmem:[#allocation2 + $0x18] sm:$0xff] %vm191_vm0, %v2835_v0  ;;  %s2843_s10 = smov 32   ;;  %s2844_s11 = smov 16   ;;  %vm435_vm6 = vcmask 392192   ;;  %vm437_vm7 = vcmask 523264   ;;  %vm439_vm8 = vcmask 654336  }
  0x32   : > { %197 = vst.msk [vmem:[#allocation2 + $0x20] sm:$0xff] %vm191_vm0, %v2835_v0  ;;  %v2980_v34 = vunpack.c.0.s8 %v268_v29  ;;  %v2994_v52 = vunpack.c.0.s8 %v292_v43  ;;  %s2845_s17 = smov 48   ;;  %s2846_s19 = smov 112   ;;  %vm441_vm9 = vcmask 785408   ;;  %vm443_vm10 = vcmask 916480  }
  0x33   : > { %202 = vst.msk [vmem:[#allocation2 + $0x48] sm:$0xff] %vm191_vm0, %v2835_v0  ;;  %s2847_s20 = smov 80   ;;  %vm2116_vm11 = vcmask 1043456   ;;  %vm2132_vm12 = vcmask 293888   ;;  %s2279_s30 = sshll.u32 %s2955_s29, 4 }
  0x34   : > { %203 = vst.msk [vmem:[#allocation2 + $0x50] sm:$0xff] %vm191_vm0, %v2835_v0  ;;  %s2290_s4 = sshll.u32 %s2890_s16, 4 }
  0x35   : > { %227 = vrot.lane.b32.xlu1 %v208_v4, %s2836_s5  ;;  %223 = vrot.lane.b32.xlu0 %v206_v5, %s2836_s5  ;;  %201 = vst.msk [vmem:[#allocation2 + $0x40] sm:$0x3] %vm194_vm1, %v2835_v0 }
  0x36   : > { %231 = vrot.lane.b32.xlu2 %v210_v6, %s2836_s5  ;;  %195 = vst.msk [vmem:[#allocation2 + $0x10] sm:$0x3] %vm194_vm1, %v2835_v0 }
  0x37   : > { %198 = vst.msk [vmem:[#allocation2 + $0x28] sm:$0x3] %vm194_vm1, %v2835_v0 }
  0x38   : > { %204 = vst.msk [vmem:[#allocation2 + $0x58] sm:$0x3] %vm194_vm1, %v2835_v0 }
  0x3d   : > { %235 = vrot.lane.b32.xlu1 %v212_v7, %s2836_s5  ;;  %233 = vrot.lane.b32.xlu0 %v211_v8, %s2836_s5 }
  0x88   : > { %v230_v9 = vpop.permute.xlu2 %229 }
  0x89   : > { %250 = vst.msk [vmem:[#allocation2 + $0x31] sm:$0xff] %vm245_vm2, %v230_v9 }
  0x90   : > { %v232_v10 = vpop.permute.xlu2 %231  ;;  %v258_v11 = vld [vmem:[#allocation2 + $0x30] sm:$0xff] }
  0x91   : > { %251 = vst.msk [vmem:[#allocation2 + $0x39] sm:$0xff] %vm245_vm2, %v232_v10  ;;  %v262_v16 = vrot.slane %v258_v11, 4  ;;  %v2997_v55 = vld [vmem:[#allocation2 + $0x31] sm:$0xff] }
  0x98   : > { %v259_v12 = vld [vmem:[#allocation2 + $0x38] sm:$0xff] }
  0x99   : > { %v2363_v13 = vpack.i.bf16 %v259_v12, %v258_v11  ;;  %v319_v21 = vrot.slane %v259_v12, 4  ;;  %v2991_v51 = vld [vmem:[#allocation2 + $0x39] sm:$0xff] }
  0x9a   : > { %v3003_v59 = vpack.i.bf16 %v2991_v51, %v2997_v55 }
  0x9b   : > { %2364 = vrot.lane.b32.xlu2 %v2363_v13, %s2837_s23 }
  0x9f   : > { %v226_v14 = vpop.permute.xlu1 %225  ;;  %v222_v15 = vpop.permute.xlu0 %221 }
  0xa0   : > { %248 = vst.msk [vmem:[#allocation2 + $0x19] sm:$0xff] %vm245_vm2, %v226_v14 }
  0xa1   : > { %246 = vst.msk [vmem:[#allocation2 + $0x1] sm:$0xff] %vm245_vm2, %v222_v15 }
  0xa7   : > { %v228_v17 = vpop.permute.xlu1 %227  ;;  %v224_v18 = vpop.permute.xlu0 %223  ;;  %v256_v24 = vld [vmem:[#allocation2 + $0x18] sm:$0xff] }
  0xa8   : > { %249 = vst.msk [vmem:[#allocation2 + $0x21] sm:$0xff] %vm245_vm2, %v228_v17  ;;  %v254_v19 = vld [vmem:[#allocation2] sm:$0xff]  ;;  %v277_v38 = vrot.slane %v256_v24, 4 }
  0xa9   : > { %247 = vst.msk [vmem:[#allocation2 + $0x9] sm:$0xff] %vm245_vm2, %v224_v18  ;;  %v264_v20 = vsel %vm263_vm3, %v262_v16, %v254_v19  ;;  %v265_v32 = vrot.slane %v254_v19, 4  ;;  %v3011_v4 = vld [vmem:[#allocation2 + $0x1] sm:$0xff] }
  0xaa   : > { %v270_v44 = vperm.slane %v264_v20, %v2980_v34 }
  0xab   : > { %v266_v35 = vsel %vm263_vm3, %v258_v11, %v265_v32 }
  0xac   : > { %v274_v41 = vperm.slane %v266_v35, %v2980_v34  ;;  %v289_v62 = vrot.slane %v270_v44, 4 }
  0xae   : > { %v301_v53 = vrot.slane %v274_v41, 4 }
  0xaf   : > { %v236_v22 = vpop.permute.xlu1 %235  ;;  %v234_v23 = vpop.permute.xlu0 %233  ;;  %v257_v25 = vld [vmem:[#allocation2 + $0x20] sm:$0xff] }
  0xb0   : > { %253 = vst.msk [vmem:[#allocation2 + $0x51] sm:$0xff] %vm245_vm2, %v236_v22  ;;  %v2972_v26 = vpack.i.bf16 %v257_v25, %v256_v24  ;;  %v255_v27 = vld [vmem:[#allocation2 + $0x8] sm:$0xff]  ;;  %v333_v37 = vrot.slane %v257_v25, 4 }
  0xb1   : > { %252 = vst.msk [vmem:[#allocation2 + $0x49] sm:$0xff] %vm245_vm2, %v234_v23  ;;  %v320_v30 = vsel %vm263_vm3, %v319_v21, %v255_v27  ;;  %v2373_v31 = vpack.i.bf16 %v255_v27, %v254_v19  ;;  %v321_v33 = vrot.slane %v255_v27, 4  ;;  %v3005_v60 = vld [vmem:[#allocation2 + $0x9] sm:$0xff]  ;;  %v3058_v27 = vld [vmem:[#allocation2 + $0x19] sm:$0xff] }
  0xb2   : > { %2359 = vrot.lane.b32.xlu1 %v2972_v26, %s2837_s23  ;;  %v326_v54 = vperm.slane %v320_v30, %v2980_v34  ;;  %v2393_v9 = vpack.i.bf16 %v3005_v60, %v3011_v4 }
  0xb3   : > { %2374 = vrot.lane.b32.xlu2 %v2373_v31, %s2839_s7  ;;  %2354 = vrot.lane.b32.xlu0 %v2373_v31, %s2837_s23  ;;  %v322_v36 = vsel %vm263_vm3, %v259_v12, %v321_v33 }
  0xb4   : > { %v330_v47 = vperm.slane %v322_v36, %v2980_v34  ;;  %v345_v12 = vrot.slane %v326_v54, 4 }
  0xb6   : > { %v357_v58 = vrot.slane %v330_v47, 4 }
  0xb7   : > { %v3050_v22 = vld [vmem:[#allocation2 + $0x51] sm:$0xff] }
  0xb8   : > { %v260_v39 = vld [vmem:[#allocation2 + $0x48] sm:$0xff]  ;;  %v261_v40 = vld [vmem:[#allocation2 + $0x50] sm:$0xff] }
  0xb9   : > { %v331_v45 = vrot.slane %v261_v40, 4  ;;  %v2388_v46 = vpack.i.bf16 %v261_v40, %v260_v39  ;;  %v275_v48 = vrot.slane %v260_v39, 4  ;;  %v278_v49 = vsel %vm263_vm3, %v260_v39, %v277_v38  ;;  %v3048_v21 = vld [vmem:[#allocation2 + $0x49] sm:$0xff]  ;;  %v3070_v32 = vld [vmem:[#allocation2 + $0x52] sm:$0xff] }
  0xba   : > { %2384 = vrot.lane.b32.xlu1 %v2363_v13, %s2839_s7  ;;  %v334_v50 = vsel %vm263_vm3, %v261_v40, %v333_v37  ;;  %v286_v56 = vperm.slane %v278_v49, %v2980_v34  ;;  %v3068_v31 = vld [vmem:[#allocation2 + $0x4a] sm:$0xff]  ;;  %v2418_v38 = vpack.i.bf16 %v3048_v21, %v3058_v27  ;;  %v3105_v49 = vld [vmem:[#allocation2 + $0x1a] sm:$0xff] }
  0xbb   : > { %2389 = vrot.lane.b32.xlu2 %v2388_v46, %s2839_s7  ;;  %2369 = vrot.lane.b32.xlu0 %v2388_v46, %s2837_s23  ;;  %v342_v57 = vperm.slane %v334_v50, %v2980_v34  ;;  %v276_v61 = vsel %vm263_vm3, %v275_v48, %v256_v24  ;;  %v332_v63 = vsel %vm263_vm3, %v331_v45, %v257_v25  ;;  %v3054_v24 = vld [vmem:[#allocation2 + $0x21] sm:$0xff] }
  0xbc   : > { %v302_v0 = vsel %vm263_vm3, %v286_v56, %v301_v53  ;;  %v299_v2 = vrot.slane %v286_v56, 4  ;;  %v282_v7 = vperm.slane %v276_v61, %v2980_v34  ;;  %v338_v8 = vperm.slane %v332_v63, %v2980_v34  ;;  %v3107_v50 = vld [vmem:[#allocation2 + $0x22] sm:$0xff] }
  0xbd   : > { %v358_v1 = vsel %vm263_vm3, %v342_v57, %v357_v58  ;;  %v355_v3 = vrot.slane %v342_v57, 4  ;;  %v3014_v5 = vperm.slane %v302_v0, %v2994_v52  ;;  %v2398_v28 = vpack.i.bf16 %v3054_v24, %v3058_v27  ;;  %v3119_v58 = vld [vmem:[#allocation2 + $0xa] sm:$0xff]  ;;  %v3121_v61 = vld [vmem:[#allocation2 + $0x2] sm:$0xff] }
  0xbe   : > { %v3017_v6 = vperm.slane %v358_v1, %v2994_v52  ;;  %v300_v10 = vsel %vm263_vm3, %v299_v2, %v274_v41  ;;  %v290_v16 = vsel %vm263_vm3, %v282_v7, %v289_v62  ;;  %v346_v17 = vsel %vm263_vm3, %v338_v8, %v345_v12  ;;  %v3131_v1 = vld [vmem:[#allocation2 + $0x32] sm:$0xff]  ;;  %v3133_v2 = vld [vmem:[#allocation2 + $0x3a] sm:$0xff] }
  0xbf   : > { %v356_v11 = vsel %vm263_vm3, %v355_v3, %v330_v47  ;;  %v3030_v14 = vperm.slane %v300_v10, %v2994_v52  ;;  %v3043_v19 = vperm.slane %v290_v16, %v2994_v52  ;;  %v3046_v20 = vperm.slane %v346_v17, %v2994_v52 }
  0xc0   : > { %v2463_v13 = vpack.i.bf16 %v3017_v6, %v3014_v5  ;;  %v3033_v15 = vperm.slane %v356_v11, %v2994_v52  ;;  %v287_v25 = vrot.slane %v282_v7, 4  ;;  %v343_v29 = vrot.slane %v338_v8, 4 }
  0xc1   : > { %v2453_v23 = vpack.i.bf16 %v3046_v20, %v3043_v19  ;;  %v315_v35 = vrot.slane %v3030_v14, 4  ;;  %v313_v37 = vrot.slane %v3043_v19, 4  ;;  %v369_v39 = vrot.slane %v3046_v20, 4 }
  0xc2   : > { %2404 = vrot.lane.b32.xlu1 %v3003_v59, %s2837_s23  ;;  %v2458_v18 = vpack.i.bf16 %v3033_v15, %v3030_v14  ;;  %v3066_v30 = vsel %vm263_vm3, %v287_v25, %v270_v44  ;;  %v3073_v33 = vsel %vm263_vm3, %v343_v29, %v326_v54  ;;  %v371_v36 = vrot.slane %v3033_v15, 4 }
  0xc3   : > { %2394 = vrot.lane.b32.xlu2 %v2393_v9, %s2837_s23  ;;  %2379 = vrot.lane.b32.xlu0 %v2972_v26, %s2839_s7  ;;  %v2408_v26 = vpack.i.bf16 %v3050_v22, %v3048_v21  ;;  %v2423_v40 = vpack.i.bf16 %v3070_v32, %v3068_v31  ;;  %v3086_v41 = vsel %vm263_vm3, 0.0, %v315_v35  ;;  %v3092_v43 = vsel %vm263_vm3, 0.0, %v313_v37 }
  0xc4   : > { %v3089_v42 = vsel %vm263_vm3, 0.0, %v371_v36  ;;  %v3098_v45 = vsel %vm263_vm3, 0.0, %v369_v39  ;;  %v317_v46 = vrot.slane %v3014_v5, 4  ;;  %v373_v48 = vrot.slane %v3017_v6, 4 }
  0xc5   : > { %v2503_v44 = vpack.i.bf16 %v3089_v42, %v3086_v41  ;;  %v2498_v47 = vpack.i.bf16 %v3098_v45, %v3092_v43  ;;  %v2433_v57 = vpack.i.bf16 %v3107_v50, %v3105_v49  ;;  %v2428_v62 = vpack.i.bf16 %v3054_v24, %v3050_v22 }
  0xc6   : > { %v3110_v53 = vsel %vm263_vm3, 0.0, %v317_v46  ;;  %v3113_v54 = vsel %vm263_vm3, 0.0, %v373_v48  ;;  %v1548_v63 = vrot.slane %v3119_v58, 4  ;;  %v1492_v0 = vrot.slane %v3121_v61, 4 }
  0xc7   : > { %v2508_v56 = vpack.i.bf16 %v3113_v54, %v3110_v53  ;;  %v1504_v3 = vrot.slane %v3105_v49, 4  ;;  %v1560_v7 = vrot.slane %v3107_v50, 4  ;;  %v2438_v11 = vpack.i.bf16 %v3133_v2, %v3131_v1 }
  0xc8   : > { %v1549_v8 = vsel %vm263_vm3, %v3133_v2, %v1548_v63  ;;  %v880_v48 = vrot.slane %v2997_v55, 4  ;;  %v882_v63 = vrot.slane %v3011_v4, 4  ;;  %v3299_v20 = vperm.slane %v3066_v30, %v2994_v52 }
  0xc9   : > { %v1505_v10 = vsel %vm263_vm3, %v3068_v31, %v1504_v3  ;;  %v1561_v12 = vsel %vm263_vm3, %v3070_v32, %v1560_v7  ;;  %v3153_v17 = vperm.slane %v1549_v8, %v2980_v34  ;;  %v938_v7 = vrot.slane %v3005_v60, 4 }
  0xca   : > { %2414 = vrot.lane.b32.xlu1 %v2393_v9, %s2839_s7  ;;  %v1493_v9 = vsel %vm263_vm3, %v3131_v1, %v1492_v0  ;;  %v3157_v25 = vperm.slane %v1505_v10, %v2980_v34 }
  0xcb   : > { %2409 = vrot.lane.b32.xlu2 %v2408_v26, %s2837_s23  ;;  %2399 = vrot.lane.b32.xlu0 %v2398_v28, %s2837_s23  ;;  %v3150_v16 = vperm.slane %v1493_v9, %v2980_v34  ;;  %v3162_v26 = vperm.slane %v1561_v12, %v2980_v34  ;;  %v1584_v29 = vrot.slane %v3153_v17, 4  ;;  %v892_v12 = vrot.slane %v3048_v21, 4 }
  0xcc   : > { %v1526_v15 = vrot.slane %v3157_v25, 4 }
  0xcd   : > { %v1528_v28 = vrot.slane %v3150_v16, 4  ;;  %v1585_v36 = vsel %vm263_vm3, %v3162_v26, %v1584_v29 }
  0xce   : > { %v1527_v30 = vsel %vm263_vm3, %v1526_v15, %v3150_v16 }
  0xcf   : > { %v1529_v35 = vsel %vm263_vm3, %v3157_v25, %v1528_v28  ;;  %v881_v28 = vsel %vm263_vm3, %v880_v48, %v3011_v4  ;;  %v1546_v48 = vrot.slane %v3133_v2, 4 }
  0xd0   : > { %v3171_v37 = vperm.slane %v1529_v35, %v2994_v52  ;;  %v2448_v35 = vpack.i.bf16 %v3119_v58, %v3121_v61  ;;  %v3221_v4 = vperm.slane %v881_v28, %v2980_v34 }
  0xd2   : > { %1898 = vrot.lane.b32.xlu1 %v3068_v31, %s2839_s7  ;;  %4746 = vst [vmem:[#allocation9_spill] sm:$0xff] %v3171_v37 }
  0xd3   : > { %2419 = vrot.lane.b32.xlu2 %v2418_v38, %s2839_s7  ;;  %2424 = vrot.lane.b32.xlu0 %v2423_v40, %s2837_s23  ;;  %v3174_v38 = vperm.slane %v1585_v36, %v2994_v52  ;;  %v1544_v40 = vrot.slane %v3171_v37, 4 }
  0xd5   : > { %4747 = vst [vmem:[#allocation10_spill] sm:$0xff] %v3174_v38  ;;  %v1600_v46 = vrot.slane %v3174_v38, 4  ;;  %v3192_v0 = vsel %vm263_vm3, 0.0, %v1544_v40 }
  0xd6   : > { %4748 = vst [vmem:[#allocation11_spill] sm:$0xff] %v3192_v0 }
  0xd7   : > { %v3195_v3 = vsel %vm263_vm3, 0.0, %v1600_v46  ;;  %v893_v46 = vsel %vm263_vm3, %v892_v12, %v3058_v27 }
  0xd8   : > { %4749 = vst [vmem:[#allocation12_spill] sm:$0xff] %v3195_v3 }
  0xda   : > { %2434 = vrot.lane.b32.xlu1 %v2433_v57, %s2837_s23  ;;  %v950_v57 = vrot.slane %v3054_v24, 4 }
  0xdb   : > { %1900 = vrot.lane.b32.xlu2 %v3070_v32, %s2839_s7  ;;  %2429 = vrot.lane.b32.xlu0 %v2428_v62, %s2839_s7  ;;  %v894_v62 = vrot.slane %v3058_v27, 4  ;;  %v3238_v27 = vperm.slane %v893_v46, %v2980_v34 }
  0xdc   : > { %v951_v9 = vsel %vm263_vm3, %v3050_v22, %v950_v57 }
  0xdd   : > { %v895_v8 = vsel %vm263_vm3, %v3048_v21, %v894_v62  ;;  %v959_v40 = vperm.slane %v951_v9, %v2980_v34  ;;  %v939_v21 = vsel %vm263_vm3, %v2991_v51, %v938_v7  ;;  %v906_v7 = vrot.slane %v3221_v4, 4 }
  0xde   : > { %v903_v36 = vperm.slane %v895_v8, %v2980_v34  ;;  %v947_v62 = vperm.slane %v939_v21, %v2980_v34  ;;  %v1502_v8 = vrot.slane %v3068_v31, 4  ;;  %v1558_v9 = vrot.slane %v3070_v32, 4 }
  0xdf   : > { %v907_v31 = vsel %vm263_vm3, %v3238_v27, %v906_v7  ;;  %v904_v7 = vrot.slane %v3238_v27, 4 }
  0xe1   : > { %v905_v27 = vsel %vm263_vm3, %v904_v7, %v3221_v4 }
  0xe2   : > { %1892 = vrot.lane.b32.xlu1 %v3107_v50, %s2839_s7 }
  0xe3   : > { %2439 = vrot.lane.b32.xlu2 %v2438_v11, %s2837_s23  ;;  %1890 = vrot.lane.b32.xlu0 %v3105_v49, %s2839_s7  ;;  %v948_v11 = vrot.slane %v3050_v22, 4  ;;  %v883_v22 = vsel %vm263_vm3, %v2997_v55, %v882_v63  ;;  %v916_v55 = vrot.slane %v903_v36, 4  ;;  %v1547_v63 = vsel %vm263_vm3, %v1546_v48, %v3119_v58 }
  0xea   : > { %2444 = vrot.lane.b32.xlu1 %v3003_v59, %s2839_s7  ;;  %v936_v59 = vrot.slane %v2991_v51, 4  ;;  %v891_v51 = vperm.slane %v883_v22, %v2980_v34  ;;  %v1559_v22 = vsel %vm263_vm3, %v1558_v9, %v3107_v50  ;;  %v1582_v50 = vrot.slane %v3162_v26, 4 }
  0xeb   : > { %1894 = vrot.lane.b32.xlu2 %v3131_v1, %s2839_s7  ;;  %1896 = vrot.lane.b32.xlu0 %v3133_v2, %s2839_s7 }
  0xec   : > { %v937_v29 = vsel %vm263_vm3, %v936_v59, %v3005_v60  ;;  %v949_v60 = vsel %vm263_vm3, %v948_v11, %v3054_v24  ;;  %v972_v59 = vrot.slane %v959_v40, 4  ;;  %v1490_v24 = vrot.slane %v3131_v1, 4 }
  0xed   : > { %v3230_v57 = vperm.slane %v937_v29, %v2980_v34  ;;  %v3241_v2 = vperm.slane %v949_v60, %v2980_v34  ;;  %v917_v12 = vsel %vm263_vm3, %v916_v55, %v891_v51  ;;  %v918_v29 = vrot.slane %v891_v51, 4 }
  0xee   : > { %v1491_v11 = vsel %vm263_vm3, %v1490_v24, %v3121_v61  ;;  %v973_v28 = vsel %vm263_vm3, %v972_v59, %v947_v62  ;;  %v3282_v21 = vperm.slane %v917_v12, %v2994_v52  ;;  %v1583_v48 = vsel %vm263_vm3, %v1582_v50, %v3153_v17 }
  0xef   : > { %v962_v1 = vrot.slane %v3230_v57, 4  ;;  %v919_v5 = vsel %vm263_vm3, %v903_v36, %v918_v29  ;;  %v3285_v14 = vperm.slane %v973_v28, %v2994_v52  ;;  %v311_v55 = vrot.slane %v3299_v20, 4 }
  0xf0   : > { %v3292_v36 = vperm.slane %v919_v5, %v2994_v52  ;;  %v3333_v24 = vperm.slane %v1527_v30, %v2994_v52 }
  0xf1   : > { %v963_v32 = vsel %vm263_vm3, %v3241_v2, %v962_v1  ;;  %v2473_v60 = vpack.i.bf16 %v3285_v14, %v3282_v21  ;;  %v312_v1 = vsel %vm263_vm3, 0.0, %v311_v55  ;;  %v988_v15 = vrot.slane %v3285_v14, 4 }
  0xf2   : > { %1888 = vrot.lane.b32.xlu1 %v3119_v58, %s2839_s7  ;;  %v3262_v58 = vperm.slane %v1547_v63, %v2980_v34  ;;  %v3336_v63 = vperm.slane %v1583_v48, %v2994_v52 }
  0xf3   : > { %2449 = vrot.lane.b32.xlu2 %v2448_v35, %s2837_s23  ;;  %1886 = vrot.lane.b32.xlu0 %v3121_v61, %s2839_s7  ;;  %v974_v35 = vrot.slane %v947_v62, 4  ;;  %v3265_v61 = vperm.slane %v1491_v11, %v2980_v34  ;;  %s2196_s23 = scalar_lea.hbm %s4703_s3, %s2290_s4  ;;  %s190_s7 = scalar_lea.vmem [#allocation6], %s2279_s30 }
  0xf4   : > { %v1572_v26 = vrot.slane %v3262_v58, 4  ;;  %v2488_v28 = vpack.i.bf16 %v3336_v63, %v3333_v24  ;;  %v1598_v30 = vrot.slane %v3336_v63, 4 }
  0xf5   : > { %v975_v6 = vsel %vm263_vm3, %v959_v40, %v974_v35  ;;  %v3309_v40 = vperm.slane %v1559_v22, %v2980_v34  ;;  %v3325_v59 = vpop.permute.xlu2 %2364  ;;  %v932_v22 = vrot.slane %v3282_v21, 4 }
  0xf6   : > { %v3295_v19 = vperm.slane %v975_v6, %v2994_v52 }
  0xf7   : > { %v1573_v17 = vsel %vm263_vm3, %v3309_v40, %v1572_v26  ;;  %v1570_v45 = vrot.slane %v3309_v40, 4  ;;  %v933_v54 = vsel %vm263_vm3, 0.0, %v932_v22 }
  0xf8   : > { %v2478_v51 = vpack.i.bf16 %v3295_v19, %v3292_v36  ;;  %v1581_v11 = vperm.slane %v1573_v17, %v2994_v52  ;;  %v990_v50 = vrot.slane %v3295_v19, 4 }
  0xfa   : > { %2464 = vrot.lane.b32.xlu1 %v2463_v13, %s2841_s8  ;;  %v1503_v13 = vsel %vm263_vm3, %v1502_v8, %v3105_v49  ;;  %v971_v49 = vperm.slane %v963_v32, %v2994_v52  ;;  %v960_v8 = vrot.slane %v3241_v2, 4  ;;  %v3356_v32 = vperm.slane %v905_v27, %v2994_v52 }
  0xfb   : > { %2459 = vrot.lane.b32.xlu2 %v2458_v18, %s2842_s9  ;;  %2454 = vrot.lane.b32.xlu0 %v2453_v23, %s2843_s10  ;;  %v915_v18 = vperm.slane %v907_v31, %v2994_v52  ;;  %v3303_v23 = vperm.slane %v3073_v33, %v2994_v52  ;;  %v3306_v25 = vperm.slane %v1503_v13, %v2980_v34  ;;  %v1516_v33 = vrot.slane %v3265_v61, 4 }
  0xfc   : > { %v961_v2 = vsel %vm263_vm3, %v960_v8, %v3230_v57  ;;  %4750 = vst [vmem:[#allocation13_spill] sm:$0xff] %v3356_v32  ;;  %v928_v6 = vrot.slane %v3356_v32, 4  ;;  %v986_v13 = vrot.slane %v971_v49, 4  ;;  %v1596_v40 = vrot.slane %v1581_v11, 4 }
  0xfd   : > { %v2468_v46 = vpack.i.bf16 %v971_v49, %v915_v18  ;;  %v367_v62 = vrot.slane %v3303_v23, 4  ;;  %v1517_v16 = vsel %vm263_vm3, %v3306_v25, %v1516_v33  ;;  %v3359_v5 = vperm.slane %v961_v2, %v2994_v52 }
  0xfe   : > { %v1525_v9 = vperm.slane %v1517_v16, %v2994_v52  ;;  %v930_v57 = vrot.slane %v915_v18, 4  ;;  %v1514_v43 = vrot.slane %v3306_v25, 4  ;;  %v929_v21 = vsel %vm263_vm3, 0.0, %v928_v6 }
  0xff   : > { %v368_v12 = vsel %vm263_vm3, 0.0, %v367_v62  ;;  %4751 = vst [vmem:[#allocation14_spill] sm:$0xff] %v3359_v5  ;;  %v984_v4 = vrot.slane %v3359_v5, 4  ;;  %v987_v53 = vsel %vm263_vm3, 0.0, %v986_v13  ;;  %v934_v49 = vrot.slane %v3292_v36, 4 }
 0x100   : > { %v2493_v29 = vpack.i.bf16 %v368_v12, %v312_v1  ;;  %v2483_v35 = vpack.i.bf16 %v1581_v11, %v1525_v9  ;;  %v931_v18 = vsel %vm263_vm3, 0.0, %v930_v57  ;;  %v1540_v25 = vrot.slane %v1525_v9, 4 }
 0x101   : > { %v985_v14 = vsel %vm263_vm3, 0.0, %v984_v4  ;;  %v2518_v42 = vpack.i.bf16 %v987_v53, %v931_v18  ;;  %v1515_v26 = vsel %vm263_vm3, %v1514_v43, %v3265_v61  ;;  %v935_v19 = vsel %vm263_vm3, 0.0, %v934_v49 }
 0x102   : > { %2474 = vrot.lane.b32.xlu1 %v2473_v60, %s2842_s9  ;;  %v2513_v41 = vpack.i.bf16 %v985_v14, %v929_v21  ;;  %v1571_v60 = vsel %vm263_vm3, %v1570_v45, %v3262_v58  ;;  %v991_v48 = vsel %vm263_vm3, 0.0, %v990_v50  ;;  %v3403_v33 = vperm.slane %v1515_v26, %v2994_v52 }
 0x103   : > { %2469 = vrot.lane.b32.xlu2 %v2468_v46, %s2843_s10  ;;  %2479 = vrot.lane.b32.xlu0 %v2478_v51, %s2841_s8  ;;  %v1542_v46 = vrot.slane %v3333_v24, 4  ;;  %v3406_v61 = vperm.slane %v1571_v60, %v2994_v52  ;;  %v1541_v58 = vsel %vm263_vm3, 0.0, %v1540_v25  ;;  %v1597_v51 = vsel %vm263_vm3, 0.0, %v1596_v40 }
 0x104   : > { %4752 = vst [vmem:[#allocation15_spill] sm:$0xff] %v3403_v33  ;;  %v1599_v62 = vsel %vm263_vm3, 0.0, %v1598_v30  ;;  %v2528_v16 = vpack.i.bf16 %v991_v48, %v935_v19  ;;  %v2538_v17 = vpack.i.bf16 %v1597_v51, %v1541_v58  ;;  %v1538_v24 = vrot.slane %v3403_v33, 4 }
 0x105   : > { %4753 = vst [vmem:[#allocation16_spill] sm:$0xff] %v3406_v61  ;;  %v1543_v55 = vsel %vm263_vm3, 0.0, %v1542_v46  ;;  %v1594_v63 = vrot.slane %v3406_v61, 4 }
 0x106   : > { %v2543_v7 = vpack.i.bf16 %v1599_v62, %v1543_v55  ;;  %v1539_v1 = vsel %vm263_vm3, 0.0, %v1538_v24 }
 0x107   : > { %v1595_v12 = vsel %vm263_vm3, 0.0, %v1594_v63 }
 0x10a   : > { %2489 = vrot.lane.b32.xlu1 %v2488_v28, %s2842_s9  ;;  %v2367_v28 = vunpack.i.h.bf16 %v3325_v59 }
 0x10b   : > { %2494 = vrot.lane.b32.xlu2 %v2493_v29, %s2844_s11  ;;  %2484 = vrot.lane.b32.xlu0 %v2483_v35, %s2843_s10  ;;  %v2366_v29 = vunpack.i.l.bf16 %v3325_v59  ;;  %v2533_v35 = vpack.i.bf16 %v1595_v12, %v1539_v1 }
 0x10c   : > { %v540_v22 = vrot.slane %v2367_v28, 4 }
 0x10d   : > { %v3353_v31 = vpop.permute.xlu2 %2374 }
 0x10e   : > { %v2377_v27 = vunpack.i.h.bf16 %v3353_v31  ;;  %v2376_v2 = vunpack.i.l.bf16 %v3353_v31 }
 0x110   : > { %v748_v21 = vrot.slane %v2377_v27, 4  ;;  %v692_v59 = vrot.slane %v2376_v2, 4 }
 0x112   : > { %2499 = vrot.lane.b32.xlu1 %v2498_v47, %s2845_s17 }
 0x113   : > { %2509 = vrot.lane.b32.xlu2 %v2508_v56, %s2846_s19  ;;  %2504 = vrot.lane.b32.xlu0 %v2503_v44, %s2847_s20  ;;  %v989_v56 = vsel %vm263_vm3, 0.0, %v988_v15  ;;  %v484_v15 = vrot.slane %v2366_v29, 4 }
 0x114   : > { %v2523_v44 = vpack.i.bf16 %v989_v56, %v933_v54 }
 0x115   : > { %v3379_v47 = vpop.permute.xlu2 %2389 }
 0x116   : > { %v2392_v57 = vunpack.i.h.bf16 %v3379_v47  ;;  %v2391_v13 = vunpack.i.l.bf16 %v3379_v47 }
 0x118   : > { %v3435_v31 = vrot.slane %v2392_v57, 4  ;;  %v3439_v54 = vrot.slane %v2391_v13, 4 }
 0x11a   : > { %2514 = vrot.lane.b32.xlu1 %v2513_v41, %s2844_s11 }
 0x11b   : > { %2524 = vrot.lane.b32.xlu2 %v2523_v44, %s2847_s20  ;;  %2519 = vrot.lane.b32.xlu0 %v2518_v42, %s2845_s17 }
 0x11d   : > { %v3398_v36 = vpop.permute.xlu2 %2394 }
 0x11e   : > { %v2397_v43 = vunpack.i.h.bf16 %v3398_v36  ;;  %v2396_v26 = vunpack.i.l.bf16 %v3398_v36 }
 0x120   : > { %v1152_v40 = vrot.slane %v2397_v43, 4 }
 0x122   : > { %2529 = vrot.lane.b32.xlu1 %v2528_v16, %s2846_s19 }
 0x123   : > { %2539 = vrot.lane.b32.xlu2 %v2538_v17, %s2845_s17  ;;  %2544 = vrot.lane.b32.xlu0 %v2543_v7, %s2847_s20 }
 0x124   : > { %v3417_v8 = vpop.permute.xlu1 %2359 }
 0x125   : > { %v3419_v9 = vpop.permute.xlu2 %2409  ;;  %v2355_v11 = vpop.permute.xlu0 %2354  ;;  %v2362_v56 = vunpack.i.h.bf16 %v3417_v8  ;;  %v2361_v41 = vunpack.i.l.bf16 %v3417_v8  ;;  %v1096_v8 = vrot.slane %v2396_v26, 4 }
 0x126   : > { %v2357_v6 = vunpack.i.h.bf16 %v2355_v11  ;;  %v2356_v4 = vunpack.i.l.bf16 %v2355_v11  ;;  %v2412_v60 = vunpack.i.h.bf16 %v3419_v9  ;;  %v4704_v46 = vunpack.i.l.bf16 %v3419_v9 }
 0x127   : > { %v554_v51 = vrot.slane %v2362_v56, 4  ;;  %v498_v55 = vrot.slane %v2361_v41, 4 }
 0x128   : > { %v542_v14 = vrot.slane %v2357_v6, 4  ;;  %v486_v18 = vrot.slane %v2356_v4, 4  ;;  %v541_v44 = vsel %vm263_vm3, %v540_v22, %v2357_v6  ;;  %v485_v49 = vsel %vm263_vm3, %v484_v15, %v2356_v4 }
 0x129   : > { %v3453_v62 = vperm.slane %v541_v44, %v2980_v34  ;;  %v3456_v16 = vperm.slane %v485_v49, %v2980_v34 }
 0x12a   : > { %2534 = vrot.lane.b32.xlu1 %v2533_v35, %s2844_s11  ;;  %v543_v30 = vsel %vm263_vm3, %v2367_v28, %v542_v14  ;;  %v487_v19 = vsel %vm263_vm3, %v2366_v29, %v486_v18  ;;  %v3467_v29 = vrot.slane %v2412_v60, 4  ;;  %v3471_v35 = vrot.slane %v4704_v46, 4 }
 0x12b   : > { %v551_v11 = vperm.slane %v543_v30, %v2980_v34  ;;  %v495_v1 = vperm.slane %v487_v19, %v2980_v34  ;;  %v566_v15 = vrot.slane %v3453_v62, 4 }
 0x12c   : > { %v2385_v45 = vpop.permute.xlu1 %2384 }
 0x12d   : > { %v3431_v53 = vpop.permute.xlu2 %2419  ;;  %v2370_v42 = vpop.permute.xlu0 %2369  ;;  %v2387_v50 = vunpack.i.h.bf16 %v2385_v45  ;;  %v2386_v25 = vunpack.i.l.bf16 %v2385_v45  ;;  %v510_v45 = vrot.slane %v3456_v16, 4 }
 0x12e   : > { %v2372_v48 = vunpack.i.h.bf16 %v2370_v42  ;;  %v2371_v58 = vunpack.i.l.bf16 %v2370_v42 }
 0x12f   : > { %v746_v17 = vrot.slane %v2387_v50, 4  ;;  %v690_v24 = vrot.slane %v2386_v25, 4  ;;  %v693_v63 = vsel %vm263_vm3, %v2386_v25, %v692_v59  ;;  %v749_v7 = vsel %vm263_vm3, %v2387_v50, %v748_v21 }
 0x130   : > { %v555_v12 = vsel %vm263_vm3, %v2372_v48, %v554_v51  ;;  %v496_v6 = vrot.slane %v2371_v58, 4  ;;  %v499_v4 = vsel %vm263_vm3, %v2371_v58, %v498_v55  ;;  %v3479_v21 = vperm.slane %v693_v63, %v2980_v34 }
 0x131   : > { %v3482_v59 = vperm.slane %v749_v7, %v2980_v34  ;;  %v691_v18 = vsel %vm263_vm3, %v690_v24, %v2376_v2  ;;  %v747_v42 = vsel %vm263_vm3, %v746_v17, %v2377_v27  ;;  %v552_v44 = vrot.slane %v2372_v48, 4 }
 0x132   : > { %v563_v49 = vperm.slane %v555_v12, %v2980_v34  ;;  %v578_v50 = vrot.slane %v551_v11, 4  ;;  %v522_v25 = vrot.slane %v495_v1, 4  ;;  %v507_v30 = vperm.slane %v499_v4, %v2980_v34 }
 0x133   : > { %v497_v55 = vsel %vm263_vm3, %v496_v6, %v2361_v41  ;;  %v3492_v7 = vperm.slane %v691_v18, %v2980_v34  ;;  %v728_v27 = vrot.slane %v3479_v21, 4  ;;  %v3496_v2 = vperm.slane %v747_v42, %v2980_v34 }
 0x134   : > { %v2405_v28 = vpop.permute.xlu1 %2404  ;;  %v553_v24 = vsel %vm263_vm3, %v552_v44, %v2362_v56  ;;  %v576_v12 = vrot.slane %v563_v49, 4  ;;  %v3501_v10 = vperm.slane %v497_v55, %v2980_v34  ;;  %v523_v6 = vsel %vm263_vm3, %v507_v30, %v522_v25 }
 0x135   : > { %v3474_v22 = vpop.permute.xlu2 %1900  ;;  %v2380_v14 = vpop.permute.xlu0 %2379  ;;  %v2406_v19 = vunpack.i.l.bf16 %v2405_v28  ;;  %v2407_v63 = vunpack.i.h.bf16 %v2405_v28  ;;  %v520_v39 = vrot.slane %v507_v30, 4  ;;  %v716_v56 = vrot.slane %v3492_v7, 4 }
 0x136   : > { %v2382_v48 = vunpack.i.h.bf16 %v2380_v14  ;;  %v2381_v4 = vunpack.i.l.bf16 %v2380_v14  ;;  %v772_v14 = vrot.slane %v3496_v2, 4  ;;  %v3513_v44 = vperm.slane %v553_v24, %v2980_v34 }
 0x137   : > { %v1094_v41 = vrot.slane %v2406_v19, 4  ;;  %v1097_v28 = vsel %vm263_vm3, %v2406_v19, %v1096_v8  ;;  %v1153_v42 = vsel %vm263_vm3, %v2407_v63, %v1152_v40  ;;  %v1150_v55 = vrot.slane %v2407_v63, 4 }
 0x138   : > { %v760_v51 = vrot.slane %v2382_v48, 4  ;;  %v704_v58 = vrot.slane %v2381_v4, 4  ;;  %v3516_v25 = vperm.slane %v1097_v28, %v2980_v34  ;;  %v703_v30 = vsel %vm263_vm3, %v3439_v54, %v2381_v4 }
 0x139   : > { %v3521_v40 = vperm.slane %v523_v6, %v2994_v52  ;;  %v579_v19 = vsel %vm263_vm3, %v563_v49, %v578_v50  ;;  %v1095_v17 = vsel %vm263_vm3, %v1094_v41, %v2396_v26  ;;  %v3528_v24 = vperm.slane %v1153_v42, %v2980_v34 }
 0x13a   : > { %v761_v63 = vsel %vm263_vm3, %v2392_v57, %v760_v51  ;;  %v705_v54 = vsel %vm263_vm3, %v2391_v13, %v704_v58  ;;  %v3537_v4 = vperm.slane %v579_v19, %v2994_v52  ;;  %v521_v49 = vsel %vm263_vm3, %v520_v39, %v495_v1 }
 0x13b   : > { %v577_v50 = vsel %vm263_vm3, %v576_v12, %v551_v11  ;;  %v511_v26 = vsel %vm263_vm3, %v3501_v10, %v510_v45  ;;  %v759_v41 = vsel %vm263_vm3, %v3435_v31, %v2382_v48  ;;  %v3546_v28 = vperm.slane %v703_v30, %v2980_v34 }
 0x13c   : > { %v3505_v18 = vpop.permute.xlu1 %2414  ;;  %v3549_v47 = vperm.slane %v521_v49, %v2994_v52  ;;  %v3552_v57 = vperm.slane %v577_v50, %v2994_v52  ;;  %v1151_v39 = vsel %vm263_vm3, %v1150_v55, %v2397_v43  ;;  %v2558_v13 = vpack.i.bf16 %v3537_v4, %v3521_v40 }
 0x13d   : > { %v3508_v46 = vpop.permute.xlu2 %2439  ;;  %v2400_v8 = vpop.permute.xlu0 %2399  ;;  %v3560_v11 = vperm.slane %v511_v26, %v2994_v52  ;;  %v567_v31 = vsel %vm263_vm3, %v3513_v44, %v566_v15  ;;  %v769_v1 = vperm.slane %v761_v63, %v2980_v34  ;;  %v713_v45 = vperm.slane %v705_v54, %v2980_v34 }
 0x13e   : > { %v2553_v58 = vpack.i.bf16 %v3552_v57, %v3549_v47  ;;  %v3569_v36 = vperm.slane %v567_v31, %v2994_v52  ;;  %v3574_v51 = vperm.slane %v1095_v17, %v2980_v34  ;;  %v3577_v48 = vperm.slane %v759_v41, %v2980_v34  ;;  %2559 = vrot.lane.b32.xlu0 %v2558_v13, %s2841_s8 }
 0x13f   : > { %v2402_v15 = vunpack.i.h.bf16 %v2400_v8  ;;  %v2401_v12 = vunpack.i.l.bf16 %v2400_v8  ;;  %v1132_v42 = vrot.slane %v3516_v25, 4  ;;  %v3584_v55 = vperm.slane %v1151_v39, %v2980_v34 }
 0x140   : > { %4754 = vst [vmem:[#allocation17_spill] sm:$0xff] %v3574_v51  ;;  %2554 = vrot.lane.b32.xlu1 %v2553_v58, %s2842_s9  ;;  %v2548_v17 = vpack.i.bf16 %v3569_v36, %v3560_v11  ;;  %v717_v30 = vsel %vm263_vm3, %v3546_v28, %v716_v56  ;;  %v1188_v63 = vrot.slane %v3528_v24, 4  ;;  %v782_v50 = vrot.slane %v769_v1, 4 }
 0x141   : > { %4755 = vst [vmem:[#allocation18_spill] sm:$0xff] %v3584_v55  ;;  %v1163_v8 = vsel %vm263_vm3, %v3467_v29, %v2402_v15  ;;  %v1164_v54 = vrot.slane %v2402_v15, 4  ;;  %v1107_v49 = vsel %vm263_vm3, %v3471_v35, %v2401_v12  ;;  %v726_v26 = vrot.slane %v713_v45, 4 }
 0x142   : > { %2549 = vrot.lane.b32.xlu2 %v2548_v17, %s2843_s10  ;;  %v1108_v41 = vrot.slane %v2401_v12, 4  ;;  %v3600_v39 = vperm.slane %v717_v30, %v2994_v52  ;;  %v773_v13 = vsel %vm263_vm3, %v3577_v48, %v772_v14  ;;  %v729_v29 = vsel %vm263_vm3, %v713_v45, %v728_v27 }
 0x143   : > { %v1165_v56 = vsel %vm263_vm3, %v2412_v60, %v1164_v54  ;;  %v4756_v35 = vrot.slane %v3482_v59, 4  ;;  %v3614_v58 = vperm.slane %v1163_v8, %v2980_v34  ;;  %v4757_v12 = vunpack.i.l.bf16 %v3419_v9 }
 0x144   : > { %v3571_v43 = vpop.permute.xlu1 %1898  ;;  %v1173_v15 = vperm.slane %v1165_v56, %v2980_v34  ;;  %v3621_v17 = vperm.slane %v1107_v49, %v2980_v34  ;;  %v3625_v27 = vperm.slane %v773_v13, %v2994_v52  ;;  %v3628_v45 = vperm.slane %v729_v29, %v2994_v52 }
 0x145   : > { %v3580_v6 = vpop.permute.xlu2 %1894  ;;  %v3591_v19 = vpop.permute.xlu0 %2424  ;;  %v785_v31 = vsel %vm263_vm3, %v769_v1, %v4756_v35  ;;  %v1109_v60 = vsel %vm263_vm3, %v4757_v12, %v1108_v41  ;;  %v1120_v30 = vrot.slane %v3574_v51, 4  ;;  %v1176_v9 = vrot.slane %v3584_v55, 4 }
 0x146   : > { %v1117_v14 = vperm.slane %v1109_v60, %v2980_v34  ;;  %v3631_v1 = vperm.slane %v785_v31, %v2994_v52  ;;  %v727_v8 = vsel %vm263_vm3, %v726_v26, %v3479_v21  ;;  %v783_v54 = vsel %vm263_vm3, %v782_v50, %v3482_v59 }
 0x147   : > { %v2563_v56 = vpack.i.bf16 %v3625_v27, %v3600_v39  ;;  %v3646_v29 = vperm.slane %v727_v8, %v2994_v52  ;;  %v4758_v31 = vunpack.i.h.bf16 %v3431_v53  ;;  %v4759_v21 = vunpack.i.l.bf16 %v3431_v53 }
 0x148   : > { %v1130_v41 = vrot.slane %v1117_v14, 4  ;;  %v2573_v13 = vpack.i.bf16 %v3631_v1, %v3628_v45  ;;  %v1186_v59 = vrot.slane %v1173_v15, 4  ;;  %v3653_v50 = vperm.slane %v783_v54, %v2994_v52 }
 0x149   : > { %v1312_v12 = vrot.slane %v4758_v31, 4  ;;  %v1314_v26 = vrot.slane %v4759_v21, 4  ;;  %2564 = vrot.lane.b32.xlu1 %v2563_v56, %s2843_s10  ;;  %v1121_v0 = vsel %vm263_vm3, %v3621_v17, %v1120_v30  ;;  %v1177_v8 = vsel %vm263_vm3, %v3614_v58, %v1176_v9 }
 0x14a   : > { %4760 = vst [vmem:[#allocation19_spill] sm:$0xff] %v3653_v50  ;;  %v1133_v3 = vsel %vm263_vm3, %v1117_v14, %v1132_v42  ;;  %v1189_v31 = vsel %vm263_vm3, %v1173_v15, %v1188_v63  ;;  %v4710_v21 = vunpack.i.h.bf16 %v3508_v46  ;;  %v2441_v37 = vunpack.i.l.bf16 %v3508_v46  ;;  %2574 = vrot.lane.b32.xlu2 %v2573_v13, %s2841_s8 }
 0x14b   : > { %v2568_v54 = vpack.i.bf16 %v3653_v50, %v3646_v29  ;;  %v3670_v56 = vperm.slane %v1121_v0, %v2994_v52  ;;  %v3673_v30 = vperm.slane %v1177_v8, %v2994_v52  ;;  %v3676_v9 = vperm.slane %v1133_v3, %v2994_v52 }
 0x14c   : > { %v3639_v49 = vpop.permute.xlu1 %2434  ;;  %v3679_v42 = vperm.slane %v1189_v31, %v2994_v52  ;;  %v1131_v63 = vsel %vm263_vm3, %v1130_v41, %v3516_v25  ;;  %v1187_v0 = vsel %vm263_vm3, %v1186_v59, %v3528_v24  ;;  %v4767_v31 = vunpack.i.l.bf16 %v3431_v53 }
 0x14d   : > { %v2450_v35 = vpop.permute.xlu2 %2449  ;;  %v3655_v60 = vpop.permute.xlu0 %2429  ;;  %4761 = vst [vmem:[#allocation20_spill] sm:$0xff] %v3670_v56  ;;  %2569 = vrot.lane.b32.xlu0 %v2568_v54, %s2842_s9  ;;  %v3685_v15 = vperm.slane %v1131_v63, %v2994_v52  ;;  %v2436_v14 = vunpack.i.l.bf16 %v3639_v49  ;;  %v3691_v13 = vperm.slane %v1187_v0, %v2994_v52  ;;  %v2437_v3 = vunpack.i.h.bf16 %v3639_v49 }
 0x14e   : > { %4762 = vst [vmem:[#allocation21_spill] sm:$0xff] %v3673_v30  ;;  %v2452_v8 = vunpack.i.h.bf16 %v2450_v35  ;;  %v1313_v25 = vsel %vm263_vm3, %v1312_v12, %v4767_v31  ;;  %v4768_v41 = vunpack.i.h.bf16 %v3431_v53  ;;  %v2588_v63 = vpack.i.bf16 %v3679_v42, %v3676_v9 }
 0x14f   : > { %4763 = vst [vmem:[#allocation22_spill] sm:$0xff] %v3676_v9  ;;  %v1760_v59 = vrot.slane %v4710_v21, 4  ;;  %v1704_v0 = vrot.slane %v2441_v37, 4  ;;  %v2426_v49 = vunpack.i.l.bf16 %v3591_v19  ;;  %v2578_v38 = vpack.i.bf16 %v3673_v30, %v3670_v56 }
 0x150   : > { %4764 = vst [vmem:[#allocation23_spill] sm:$0xff] %v3679_v42  ;;  %v1315_v54 = vsel %vm263_vm3, %v4768_v41, %v1314_v26  ;;  %v2427_v53 = vunpack.i.h.bf16 %v3591_v19  ;;  %v2583_v12 = vpack.i.bf16 %v3691_v13, %v3685_v15  ;;  %v1718_v26 = vrot.slane %v2436_v14, 4 }
 0x151   : > { %4765 = vst [vmem:[#allocation24_spill] sm:$0xff] %v3685_v15  ;;  %v2451_v31 = vunpack.i.l.bf16 %v2450_v35  ;;  %2579 = vrot.lane.b32.xlu1 %v2578_v38, %s2843_s10  ;;  %v1774_v21 = vrot.slane %v2437_v3, 4  ;;  %v1761_v61 = vsel %vm263_vm3, %v1760_v59, %v2452_v8  ;;  %v3719_v32 = vperm.slane %v1313_v25, %v2980_v34 }
 0x152   : > { %4766 = vst [vmem:[#allocation25_spill] sm:$0xff] %v3691_v13  ;;  %v3722_v5 = vperm.slane %v1315_v54, %v2980_v34  ;;  %2589 = vrot.lane.b32.xlu2 %v2588_v63, %s2841_s8  ;;  %v2417_v13 = vunpack.i.h.bf16 %v3505_v18  ;;  %v1716_v15 = vrot.slane %v2426_v49, 4  ;;  %v1772_v42 = vrot.slane %v2427_v53, 4 }
 0x153   : > { %v1705_v19 = vsel %vm263_vm3, %v1704_v0, %v2451_v31  ;;  %v1719_v25 = vsel %vm263_vm3, %v2426_v49, %v1718_v26  ;;  %v1706_v59 = vrot.slane %v2451_v31, 4  ;;  %v3734_v54 = vperm.slane %v1761_v61, %v2980_v34 }
 0x154   : > { %v3702_v24 = vpop.permute.xlu1 %1892  ;;  %v3729_v38 = vperm.slane %v1705_v19, %v2980_v34  ;;  %v1717_v63 = vsel %vm263_vm3, %v1716_v15, %v2436_v14  ;;  %v1775_v0 = vsel %vm263_vm3, %v2427_v53, %v1774_v21  ;;  %v1762_v9 = vrot.slane %v2452_v8, 4 }
 0x155   : > { %v3709_v33 = vpop.permute.xlu2 %2459  ;;  %v3714_v41 = vpop.permute.xlu0 %1890  ;;  %2584 = vrot.lane.b32.xlu0 %v2583_v12, %s2842_s9  ;;  %4770 = vst [vmem:[#allocation27_spill] sm:$0xff] %v3734_v54  ;;  %v2431_v35 = vunpack.i.l.bf16 %v3655_v60  ;;  %v1978_v19 = vrot.slane %v3474_v22, 4  ;;  %v2432_v12 = vunpack.i.h.bf16 %v3655_v60  ;;  %v1358_v26 = vrot.slane %v2417_v13, 4 }
 0x156   : > { %4769 = vst [vmem:[#allocation26_spill] sm:$0xff] %v3729_v38  ;;  %v1730_v56 = vrot.slane %v3729_v38, 4  ;;  %v4771_v61 = vunpack.i.l.bf16 %v3505_v18  ;;  %v3746_v15 = vperm.slane %v1719_v25, %v2980_v34  ;;  %v1773_v21 = vsel %vm263_vm3, %v1772_v42, %v2437_v3 }
 0x157   : > { %v3752_v8 = vperm.slane %v1717_v63, %v2980_v34  ;;  %v3755_v53 = vperm.slane %v1775_v0, %v2980_v34  ;;  %v1707_v60 = vsel %vm263_vm3, %v2441_v37, %v1706_v59  ;;  %v1786_v30 = vrot.slane %v3734_v54, 4 }
 0x158   : > { %v1302_v31 = vrot.slane %v4771_v61, 4  ;;  %v1922_v61 = vrot.slane %v3571_v43, 4  ;;  %v1910_v25 = vrot.slane %v3580_v6, 4  ;;  %v4774_v42 = vunpack.i.h.bf16 %v3508_v46 }
 0x159   : > { %4773 = vst [vmem:[#allocation29_spill] sm:$0xff] %v3752_v8  ;;  %v3767_v63 = vperm.slane %v1773_v21, %v2980_v34  ;;  %v1370_v0 = vrot.slane %v2432_v12, 4  ;;  %v1979_v37 = vsel %vm263_vm3, %v1978_v19, %v3702_v24  ;;  %v1731_v59 = vsel %vm263_vm3, %v3752_v8, %v1730_v56 }
 0x15a   : > { %v1763_v3 = vsel %vm263_vm3, %v4774_v42, %v1762_v9  ;;  %v3775_v55 = vperm.slane %v1707_v60, %v2980_v34  ;;  %v1980_v46 = vrot.slane %v3702_v24, 4  ;;  %v3779_v9 = vperm.slane %v1731_v59, %v2994_v52 }
 0x15b   : > { %4775 = vst [vmem:[#allocation30_spill] sm:$0xff] %v3767_v63  ;;  %v3783_v42 = vperm.slane %v1763_v3, %v2980_v34  ;;  %v1787_v19 = vsel %vm263_vm3, %v3767_v63, %v1786_v30  ;;  %v3789_v54 = vperm.slane %v1979_v37, %v2980_v34  ;;  %v1371_v59 = vsel %vm263_vm3, %v2431_v35, %v1370_v0 }
 0x15c   : > { %v2445_v49 = vpop.permute.xlu1 %2444  ;;  %v3792_v60 = vperm.slane %v1787_v19, %v2994_v52  ;;  %v1924_v21 = vrot.slane %v3714_v41, 4  ;;  %v3810_v30 = vperm.slane %v1371_v59, %v2980_v34 }
 0x15d   : > { %v3749_v14 = vpop.permute.xlu2 %2469  ;;  %v3759_v38 = vpop.permute.xlu0 %1896  ;;  %v2447_v51 = vunpack.i.h.bf16 %v2445_v49  ;;  %v2446_v24 = vunpack.i.l.bf16 %v2445_v49 }
 0x15e   : > { %4772 = vst [vmem:[#allocation28_spill] sm:$0xff] %v3749_v14  ;;  %v1368_v14 = vrot.slane %v2431_v35, 4  ;;  %v1966_v3 = vrot.slane %v3759_v38, 4  ;;  %v1923_v35 = vsel %vm263_vm3, %v1922_v61, %v3714_v41 }
 0x15f   : > { %4776 = vst [vmem:[#allocation31_spill] sm:$0xff] %v3792_v60  ;;  %v1356_v8 = vrot.slane %v2447_v51, 4  ;;  %v1300_v37 = vrot.slane %v2446_v24, 4  ;;  %v1303_v59 = vsel %vm263_vm3, %v2446_v24, %v1302_v31 }
 0x160   : > { %v1369_v56 = vsel %vm263_vm3, %v1368_v14, %v2432_v12  ;;  %v1981_v12 = vsel %vm263_vm3, %v3474_v22, %v1980_v46  ;;  %v2593_v14 = vpack.i.bf16 %v3792_v60, %v3779_v9  ;;  %v4777_v22 = vunpack.i.l.bf16 %v3505_v18 }
 0x161   : > { %v3803_v19 = vperm.slane %v1369_v56, %v2980_v34  ;;  %v1357_v49 = vsel %vm263_vm3, %v1356_v8, %v2417_v13  ;;  %v3823_v13 = vperm.slane %v1981_v12, %v2980_v34  ;;  %v1925_v8 = vsel %vm263_vm3, %v3571_v43, %v1924_v21 }
 0x162   : > { %2594 = vrot.lane.b32.xlu0 %v2593_v14, %s2843_s10  ;;  %v1301_v46 = vsel %vm263_vm3, %v1300_v37, %v4777_v22  ;;  %v3817_v56 = vperm.slane %v1357_v49, %v2980_v34  ;;  %v3839_v43 = vperm.slane %v1923_v35, %v2980_v34  ;;  %v3852_v24 = vperm.slane %v1303_v59, %v2980_v34 }
 0x163   : > { %v3828_v61 = vperm.slane %v1301_v46, %v2980_v34 }
 0x164   : > { %v1889_v50 = vpop.permute.xlu1 %1888  ;;  %v1382_v14 = vrot.slane %v3817_v56, 4 }
 0x165   : > { %v1967_v0 = vsel %vm263_vm3, %v1966_v3, %v1889_v50  ;;  %v1887_v63 = vpop.permute.xlu0 %1886  ;;  %v2495_v41 = vpop.permute.xlu2 %2494  ;;  %v1359_v3 = vsel %vm263_vm3, %v2447_v51, %v1358_v26  ;;  %v1968_v37 = vrot.slane %v1889_v50, 4  ;;  %v1326_v49 = vrot.slane %v3828_v61, 4 }
 0x166   : > { %v3820_v60 = vperm.slane %v1967_v0, %v2980_v34  ;;  %v1911_v18 = vsel %vm263_vm3, %v1910_v25, %v1887_v63  ;;  %v1912_v0 = vrot.slane %v1887_v63, 4  ;;  %v2497_v22 = vunpack.i.h.bf16 %v2495_v41 }
 0x167   : > { %v3836_v12 = vperm.slane %v1911_v18, %v2980_v34  ;;  %v1383_v31 = vsel %vm263_vm3, %v3803_v19, %v1382_v14  ;;  %v1392_v51 = vrot.slane %v3810_v30, 4  ;;  %v3846_v50 = vperm.slane %v1359_v3, %v2980_v34 }
 0x168   : > { %4778 = vst [vmem:[#allocation32_spill] sm:$0xff] %v3820_v60  ;;  %v1992_v21 = vrot.slane %v3820_v60, 4  ;;  %v2496_v25 = vunpack.i.l.bf16 %v2495_v41  ;;  %v1969_v35 = vsel %vm263_vm3, %v3759_v38, %v1968_v37  ;;  %v1327_v46 = vsel %vm263_vm3, %v3719_v32, %v1326_v49 }
 0x169   : > { %v1936_v26 = vrot.slane %v3836_v12, 4  ;;  %v3859_v18 = vperm.slane %v1383_v31, %v2994_v52  ;;  %v1913_v3 = vsel %vm263_vm3, %v3580_v6, %v1912_v0  ;;  %v445_v41 = vsel %vm431_vm4, %v3303_v23, %v2497_v22 }
 0x16a   : > { %v3866_v14 = vperm.slane %v1327_v46, %v2994_v52  ;;  %v1993_v37 = vsel %vm263_vm3, %v3789_v54, %v1992_v21  ;;  %v432_v49 = vsel %vm431_vm4, %v3299_v20, %v2496_v25  ;;  %v3883_v22 = vperm.slane %v1969_v35, %v2980_v34 }
 0x16b   : > { %v1937_v38 = vsel %vm263_vm3, %v3839_v43, %v1936_v26  ;;  %v3880_v0 = vperm.slane %v1993_v37, %v2994_v52  ;;  %v4780_v20 = vrot.slane %v3722_v5, 4  ;;  %v1798_v25 = vrot.slane %v3783_v42, 4 }
 0x16c   : > { %v3849_v63 = vpop.permute.xlu1 %2464  ;;  %v2598_v6 = vpack.i.bf16 %v3859_v18, %v3866_v14  ;;  %v3877_v23 = vperm.slane %v1937_v38, %v2994_v52  ;;  %v1393_v35 = vsel %vm263_vm3, %v1392_v51, %v3846_v50  ;;  %v2002_v46 = vrot.slane %v3823_v13, 4 }
 0x16d   : > { %4779 = vst [vmem:[#allocation33_spill] sm:$0xff] %v3849_v63  ;;  %v2455_v59 = vpop.permute.xlu0 %2454  ;;  %v1337_v26 = vsel %vm263_vm3, %v4780_v20, %v3852_v24  ;;  %2055 = vrot.lane.b32.xlu1 %v3880_v0, %s2843_s10  ;;  %v4782_v38 = vrot.slane %v3755_v53, 4  ;;  %v714_v51 = vrot.slane %v3546_v28, 4  ;;  %v3921_v20 = vperm.slane %v1393_v35, %v2994_v52 }
 0x16e   : > { %v2457_v63 = vunpack.i.h.bf16 %v2455_v59  ;;  %v2456_v60 = vunpack.i.l.bf16 %v2455_v59  ;;  %2599 = vrot.lane.b32.xlu2 %v2598_v6, %s2843_s10  ;;  %2027 = vrot.lane.b32.xlu0 %v3877_v23, %s2843_s10  ;;  %v1921_v59 = vperm.slane %v1913_v3, %v2980_v34  ;;  %v3918_v6 = vperm.slane %v1337_v26, %v2994_v52  ;;  %s2185_s10 = scalar_lea.sflag [#allocation5], %s2955_s29 }
 0x16f   : > { %v1797_v37 = vsel %vm263_vm3, %v4782_v38, %v3783_v42  ;;  %v4784_v42 = vrot.slane %v3775_v55, 4  ;;  %v508_v26 = vrot.slane %v3501_v10, 4 }
 0x170   : > { %v3886_v31 = vsel %vm433_vm5, %v432_v49, %v2456_v60  ;;  %v3889_v21 = vsel %vm433_vm5, %v445_v41, %v2457_v63  ;;  %v4781_v60 = vrot.slane %v3746_v15, 4  ;;  %v1933_v41 = vperm.slane %v1925_v8, %v2980_v34 }
 0x171   : > { %v2003_v34 = vsel %vm263_vm3, %v2002_v46, %v3883_v22  ;;  %v3929_v3 = vperm.slane %v1797_v37, %v2994_v52  ;;  %v1743_v28 = vsel %vm263_vm3, %v3746_v15, %v4784_v42  ;;  %v1799_v46 = vsel %vm263_vm3, %v3755_v53, %v1798_v25 }
 0x172   : > { %v1741_v63 = vsel %vm263_vm3, %v4781_v60, %v3775_v55  ;;  %v770_v60 = vrot.slane %v3577_v48, 4  ;;  %v1946_v37 = vrot.slane %v1933_v41, 4  ;;  %v3944_v55 = vperm.slane %v2003_v34, %v2994_v52 }
 0x173   : > { %v3926_v8 = vperm.slane %v1741_v63, %v2994_v52  ;;  %v564_v63 = vrot.slane %v3513_v44, 4  ;;  %v2608_v15 = vpack.i.bf16 %v3921_v20, %v3918_v6  ;;  %v3949_v10 = vperm.slane %v1743_v28, %v2994_v52 }
 0x174   : > { %v3915_v49 = vpop.permute.xlu1 %2474  ;;  %v534_v48 = vrot.slane %v3560_v11, 4  ;;  %v3955_v44 = vperm.slane %v1799_v46, %v2994_v52  ;;  %v590_v25 = vrot.slane %v3569_v36, 4  ;;  %v715_v34 = vsel %vm263_vm3, %v714_v51, %v3492_v7 }
 0x175   : > { %4783 = vst [vmem:[#allocation34_spill] sm:$0xff] %v3915_v49  ;;  %v3937_v35 = vpop.permute.xlu0 %2479  ;;  %v1948_v49 = vrot.slane %v1921_v59, 4  ;;  %v2603_v53 = vpack.i.bf16 %v3929_v3, %v3926_v8  ;;  %v3964_v42 = vperm.slane %v715_v34, %v2994_v52  ;;  %v771_v11 = vsel %vm263_vm3, %v770_v60, %v3496_v2 }
 0x176   : > { %4785 = vst [vmem:[#allocation35_spill] sm:$0xff] %v3937_v35  ;;  %2063 = vrot.lane.b32.xlu2 %v3944_v55, %s2842_s9  ;;  %2609 = vrot.lane.b32.xlu0 %v2608_v15, %s2842_s9  ;;  %v509_v28 = vsel %vm263_vm3, %v508_v26, %v3456_v16  ;;  %v536_v46 = vrot.slane %v3549_v47, 4  ;;  %v1947_v7 = vsel %vm263_vm3, %v1946_v37, %v1921_v59  ;;  %v1118_v2 = vrot.slane %v3621_v17, 4 }
 0x177   : > { %4786 = vst [vmem:[#allocation36_spill] sm:$0xff] %v3964_v42  ;;  %2604 = vrot.lane.b32.xlu1 %v2603_v53, %s2842_s9  ;;  %v3974_v36 = vperm.slane %v771_v11, %v2994_v52  ;;  %v3977_v51 = vperm.slane %v509_v28, %v2994_v52  ;;  %v565_v15 = vsel %vm263_vm3, %v564_v63, %v3453_v62  ;;  %v738_v16 = vrot.slane %v3964_v42, 4  ;;  %v4794_v42 = vld [vmem:[#allocation17_spill] sm:$0xff] }
 0x178   : > { %v3986_v47 = vperm.slane %v565_v15, %v2994_v52  ;;  %v592_v59 = vrot.slane %v3552_v57, 4  ;;  %v2462_v26 = vunpack.i.h.bf16 %v3709_v33  ;;  %v535_v37 = vsel %vm263_vm3, 0.0, %v534_v48 }
 0x179   : > { %4787 = vst [vmem:[#allocation37_spill] sm:$0xff] %v3974_v36  ;;  %v591_v53 = vsel %vm263_vm3, 0.0, %v590_v25  ;;  %v744_v34 = vrot.slane %v3628_v45, 4  ;;  %v2613_v62 = vpack.i.bf16 %v3955_v44, %v3949_v10  ;;  %v3998_v63 = vperm.slane %v1947_v7, %v2994_v52 }
 0x17a   : > { %4788 = vst [vmem:[#allocation38_spill] sm:$0xff] %v3977_v51  ;;  %v794_v11 = vrot.slane %v3974_v36, 4  ;;  %v4002_v57 = vsel %vm263_vm3, 0.0, %v536_v46  ;;  %v1949_v28 = vsel %vm263_vm3, %v1933_v41, %v1948_v49  ;;  %v532_v48 = vrot.slane %v3977_v51, 4  ;;  %v4793_v51 = vld [vmem:[#allocation19_spill] sm:$0xff] }
 0x17b   : > { %4790 = vst [vmem:[#allocation40_spill] sm:$0xff] %v3986_v47  ;;  %v588_v45 = vrot.slane %v3986_v47, 4  ;;  %v2623_v25 = vpack.i.bf16 %v591_v53, %v535_v37  ;;  %v739_v15 = vsel %vm263_vm3, 0.0, %v738_v16  ;;  %v4009_v38 = vsel %vm263_vm3, 0.0, %v592_v59 }
 0x17c   : > { %v3982_v60 = vpop.permute.xlu1 %2489  ;;  %4791 = vst [vmem:[#allocation41_spill] sm:$0xff] %v3998_v63  ;;  %v4014_v46 = vsel %vm263_vm3, 0.0, %v744_v34  ;;  %v800_v41 = vrot.slane %v3631_v1, 4  ;;  %v538_v49 = vrot.slane %v3521_v40, 4  ;;  %v795_v37 = vsel %vm263_vm3, 0.0, %v794_v11 }
 0x17d   : > { %4789 = vst [vmem:[#allocation39_spill] sm:$0xff] %v3982_v60  ;;  %v3995_v17 = vpop.permute.xlu0 %2484  ;;  %v594_v16 = vrot.slane %v3537_v4, 4  ;;  %v740_v59 = vrot.slane %v3600_v39, 4  ;;  %v796_v53 = vrot.slane %v3625_v27, 4  ;;  %v533_v34 = vsel %vm263_vm3, 0.0, %v532_v48 }
 0x17e   : > { %2614 = vrot.lane.b32.xlu2 %v2613_v62, %s2841_s8  ;;  %2624 = vrot.lane.b32.xlu0 %v2623_v25, %s2845_s17  ;;  %v589_v1 = vsel %vm263_vm3, 0.0, %v588_v45  ;;  %v4029_v40 = vsel %vm263_vm3, 0.0, %v800_v41  ;;  %v4032_v62 = vsel %vm263_vm3, 0.0, %v538_v49  ;;  %v4045_v45 = vpop.permute.xlu2 %2509  ;;  %v2461_v4 = vunpack.i.l.bf16 %v3709_v33 }
 0x17f   : > { %2035 = vrot.lane.b32.xlu1 %v3998_v63, %s2842_s9  ;;  %v4037_v39 = vsel %vm263_vm3, 0.0, %v594_v16  ;;  %v4040_v27 = vsel %vm263_vm3, 0.0, %v740_v59  ;;  %v4043_v48 = vsel %vm263_vm3, 0.0, %v796_v53  ;;  %v4053_v16 = vperm.slane %v1949_v28, %v2994_v52  ;;  %s2200_s9 = sshll.u32 %s2196_s23, 4  ;;  %s2201_s9 = int_to_ptr.hbm [resolvable:$true] %s2200_s9 }
 0x180   : > { %v2633_v49 = vpack.i.bf16 %v4037_v39, %v4032_v62  ;;  %v742_v53 = vrot.slane %v3646_v29, 4  ;;  %v798_v47 = vrot.slane %v4793_v51, 4  ;;  %v2638_v39 = vpack.i.bf16 %v795_v37, %v739_v15  ;;  %v4795_v29 = vld [vmem:[#allocation18_spill] sm:$0xff]  ;;  %v4797_v15 = vld [vmem:[#allocation20_spill] sm:$0xff] }
 0x181   : > { %4792 = vst [vmem:[#allocation42_spill] sm:$0xff] %v4053_v16  ;;  %v1119_v7 = vsel %vm263_vm3, %v1118_v2, %v4794_v42  ;;  %v2618_v36 = vpack.i.bf16 %v589_v1, %v533_v34  ;;  %v4796_v51 = vrot.slane %v3614_v58, 4  ;;  %v1144_v42 = vrot.slane %v4797_v15, 4  ;;  %v4798_v2 = vld [vmem:[#allocation21_spill] sm:$0xff]  ;;  %v4799_v34 = vld [vmem:[#allocation22_spill] sm:$0xff] }
 0x182   : > { %v1200_v37 = vrot.slane %v4798_v2, 4  ;;  %v1148_v1 = vrot.slane %v4799_v34, 4  ;;  %v4803_v2 = vld [vmem:[#allocation28_spill] sm:$0xff] }
 0x183   : > { %v1175_v60 = vsel %vm263_vm3, %v4796_v51, %v4795_v29  ;;  %v2471_v34 = vunpack.i.l.bf16 %v4803_v2 }
 0x184   : > { %v2500_v11 = vpop.permute.xlu1 %2499  ;;  %v4107_v29 = vsel %vm263_vm3, 0.0, %v1148_v1 }
 0x185   : > { %v2502_v25 = vunpack.i.h.bf16 %v2500_v11  ;;  %v2501_v41 = vunpack.i.l.bf16 %v2500_v11  ;;  %v4055_v59 = vpop.permute.xlu0 %2504 }
 0x186   : > { %2043 = vrot.lane.b32.xlu2 %v4053_v16, %s2841_s8  ;;  %2639 = vrot.lane.b32.xlu0 %v2638_v39, %s2844_s11  ;;  %v4805_v39 = vld [vmem:[#allocation14_spill] sm:$0xff]  ;;  %v4806_v16 = vld [vmem:[#allocation13_spill] sm:$0xff] }
 0x187   : > { %v436_v11 = vsel %vm435_vm6, %v3886_v31, %v2501_v41  ;;  %v447_v62 = vsel %vm435_vm6, %v3889_v21, %v2502_v25  ;;  %v4076_v31 = vsel %vm263_vm3, 0.0, %v742_v53  ;;  %v4079_v21 = vsel %vm263_vm3, 0.0, %v798_v47  ;;  %2619 = vrot.lane.b32.xlu1 %v2618_v36, %s2844_s11 }
 0x188   : > { %v4066_v33 = vsel %vm437_vm7, %v436_v11, %v2461_v4  ;;  %v4069_v28 = vsel %vm437_vm7, %v447_v62, %v2462_v26  ;;  %v4087_v26 = vperm.slane %v1119_v7, %v2994_v52  ;;  %v2648_v58 = vpack.i.bf16 %v4079_v21, %v4076_v31  ;;  %v4800_v4 = vld [vmem:[#allocation23_spill] sm:$0xff]  ;;  %v4801_v7 = vld [vmem:[#allocation24_spill] sm:$0xff] }
 0x189   : > { %v1204_v47 = vrot.slane %v4800_v4, 4  ;;  %v4095_v25 = vperm.slane %v1175_v60, %v2994_v52  ;;  %v4098_v41 = vsel %vm263_vm3, 0.0, %v1144_v42  ;;  %v4101_v53 = vsel %vm263_vm3, 0.0, %v1200_v37  ;;  %v4802_v60 = vld [vmem:[#allocation25_spill] sm:$0xff] }
 0x18a   : > { %v1146_v11 = vrot.slane %v4801_v7, 4  ;;  %v1202_v51 = vrot.slane %v4802_v60, 4  ;;  %v2472_v37 = vunpack.i.h.bf16 %v4803_v2 }
 0x18b   : > { %v4110_v36 = vsel %vm263_vm3, 0.0, %v1204_v47  ;;  %v4123_v47 = vpop.permute.xlu2 %2524 }
 0x18c   : > { %v2515_v62 = vpop.permute.xlu1 %2514  ;;  %v4116_v42 = vsel %vm263_vm3, 0.0, %v1146_v11  ;;  %v4121_v1 = vsel %vm263_vm3, 0.0, %v1202_v51  ;;  %4804 = vst [vmem:[#allocation19_spill] sm:$0xff] %v4123_v47 }
 0x18d   : > { %v2517_v31 = vunpack.i.h.bf16 %v2515_v62  ;;  %v2516_v21 = vunpack.i.l.bf16 %v2515_v62  ;;  %v2520_v4 = vpop.permute.xlu0 %2519  ;;  %v2668_v2 = vpack.i.bf16 %v4121_v1, %v4116_v42 }
 0x18e   : > { %v2522_v7 = vunpack.i.h.bf16 %v2520_v4  ;;  %v2521_v60 = vunpack.i.l.bf16 %v2520_v4  ;;  %v1142_v4 = vrot.slane %v4087_v26, 4 }
 0x18f   : > { %v1055_v62 = vsel %vm431_vm4, %v4805_v39, %v2517_v31  ;;  %v1048_v15 = vsel %vm431_vm4, %v4806_v16, %v2516_v21  ;;  %v1198_v39 = vrot.slane %v4095_v25, 4  ;;  %v4807_v31 = vld [vmem:[#allocation29_spill] sm:$0xff]  ;;  %v4808_v16 = vpack.i.bf16 %v4009_v38, %v4002_v57  ;;  %2634 = vrot.lane.b32.xlu1 %v2633_v49, %s2846_s19  ;;  %v4812_v57 = vld [vmem:[#allocation26_spill] sm:$0xff] }
 0x190   : > { %v1056_v11 = vsel %vm433_vm5, %v1055_v62, %v2472_v37  ;;  %v1049_v35 = vsel %vm433_vm5, %v1048_v15, %v2471_v34  ;;  %v1728_v47 = vrot.slane %v4807_v31, 4  ;;  %v4809_v21 = vpack.i.bf16 %v4029_v40, %v4014_v46  ;;  %v4810_v15 = vld [vmem:[#allocation30_spill] sm:$0xff]  ;;  %v4811_v62 = vld [vmem:[#allocation31_spill] sm:$0xff] }
 0x191   : > { %v4134_v51 = vsel %vm435_vm6, %v1056_v11, %v2522_v7  ;;  %v4137_v63 = vsel %vm435_vm6, %v1049_v35, %v2521_v60  ;;  %2629 = vrot.lane.b32.xlu2 %v4808_v16, %s2847_s20  ;;  %v1784_v37 = vrot.slane %v4810_v15, 4  ;;  %v1754_v35 = vrot.slane %v3779_v9, 4  ;;  %v4813_v40 = vld [vmem:[#allocation27_spill] sm:$0xff] }
 0x192   : > { %2654 = vrot.lane.b32.xlu0 %v4809_v21, %s2846_s19  ;;  %v1143_v7 = vsel %vm263_vm3, 0.0, %v1142_v4  ;;  %v1199_v60 = vsel %vm263_vm3, 0.0, %v1198_v39  ;;  %v1810_v38 = vrot.slane %v4811_v62, 4  ;;  %v1729_v11 = vsel %vm263_vm3, %v1728_v47, %v4812_v57 }
 0x193   : > { %v1324_v46 = vrot.slane %v3719_v32, 4  ;;  %v1785_v31 = vsel %vm263_vm3, %v1784_v37, %v4813_v40  ;;  %v4164_v49 = vsel %vm263_vm3, 0.0, %v1754_v35  ;;  %v1380_v9 = vrot.slane %v3803_v19, 4  ;;  %v2540_v21 = vpop.permute.xlu2 %2539 }
 0x194   : > { %v4153_v34 = vpop.permute.xlu1 %2529  ;;  %v2658_v16 = vpack.i.bf16 %v1199_v60, %v1143_v7  ;;  %v4168_v4 = vperm.slane %v1729_v11, %v2994_v52  ;;  %v4173_v47 = vsel %vm263_vm3, 0.0, %v1810_v38  ;;  %v4814_v32 = vpack.i.bf16 %v4043_v48, %v4040_v27 }
 0x195   : > { %v1325_v39 = vsel %vm263_vm3, %v1324_v46, %v3828_v61  ;;  %v4181_v19 = vperm.slane %v1785_v31, %v2994_v52  ;;  %v1381_v15 = vsel %vm263_vm3, %v1380_v9, %v3817_v56  ;;  %v2688_v37 = vpack.i.bf16 %v4173_v47, %v4164_v49  ;;  %v4815_v46 = vld [vmem:[#allocation16_spill] sm:$0xff]  ;;  %v4816_v31 = vld [vmem:[#allocation15_spill] sm:$0xff]  ;;  %v4823_v49 = vld [vmem:[#allocation41_spill] sm:$0xff] }
 0x196   : > { %v1934_v61 = vrot.slane %v3839_v43, 4  ;;  %v1338_v35 = vrot.slane %v3852_v24, 4  ;;  %v1394_v7 = vrot.slane %v3846_v50, 4  ;;  %v2004_v27 = vrot.slane %v3883_v22, 4 }
 0x197   : > { %2649 = vrot.lane.b32.xlu1 %v2648_v58, %s2847_s20  ;;  %v2542_v48 = vunpack.i.h.bf16 %v2540_v21  ;;  %v2541_v60 = vunpack.i.l.bf16 %v2540_v21  ;;  %v4193_v38 = vperm.slane %v1325_v39, %v2994_v52  ;;  %v2487_v56 = vunpack.i.h.bf16 %v3995_v17 }
 0x198   : > { %v4197_v43 = vperm.slane %v1381_v15, %v2994_v52  ;;  %v2486_v24 = vunpack.i.l.bf16 %v3995_v17  ;;  %v1752_v50 = vrot.slane %v4168_v4, 4  ;;  %v1808_v58 = vrot.slane %v4181_v19, 4 }
 0x199   : > { %2644 = vrot.lane.b32.xlu2 %v4814_v32, %s2845_s17  ;;  %v1935_v22 = vsel %vm263_vm3, %v1934_v61, %v3836_v12  ;;  %v1408_v21 = vrot.slane %v3921_v20, 4  ;;  %v1348_v32 = vrot.slane %v4193_v38, 4  ;;  %v4215_v15 = vsel %vm263_vm3, %v3823_v13, %v2004_v27 }
 0x19a   : > { %2659 = vrot.lane.b32.xlu0 %v2658_v16, %s2844_s11  ;;  %v1352_v16 = vrot.slane %v3918_v6, 4  ;;  %v1404_v6 = vrot.slane %v4197_v43, 4  ;;  %v4818_v13 = vpack.i.bf16 %v4110_v36, %v4107_v29  ;;  %v4236_v27 = vperm.slane %v1935_v22, %v2994_v52 }
 0x19b   : > { %v1990_v29 = vrot.slane %v3789_v54, 4  ;;  %v1753_v36 = vsel %vm263_vm3, 0.0, %v1752_v50  ;;  %v1962_v47 = vrot.slane %v4823_v49, 4 }
 0x19c   : > { %v2535_v62 = vpop.permute.xlu1 %2534  ;;  %v4225_v20 = vsel %vm263_vm3, 0.0, %v1352_v16  ;;  %v1405_v42 = vsel %vm263_vm3, 0.0, %v1404_v6  ;;  %v1406_v16 = vrot.slane %v3859_v18, 4  ;;  %v4290_v6 = vpop.permute.xlu2 %2549  ;;  %v1812_v18 = vrot.slane %v3929_v3, 4 }
 0x19d   : > { %v2537_v57 = vunpack.i.h.bf16 %v2535_v62  ;;  %v2536_v11 = vunpack.i.l.bf16 %v2535_v62  ;;  %v4817_v62 = vpack.i.bf16 %v4101_v53, %v4098_v41 }
 0x19f   : > { %v1665_v40 = vsel %vm431_vm4, %v4815_v46, %v2537_v57  ;;  %v1658_v9 = vsel %vm431_vm4, %v4816_v31, %v2536_v11  ;;  %2669 = vrot.lane.b32.xlu1 %v2668_v2, %s2847_s20  ;;  %v1958_v2 = vrot.slane %v4236_v27, 4 }
 0x1a0   : > { %v1666_v39 = vsel %vm433_vm5, %v1665_v40, %v2487_v56  ;;  %v1659_v17 = vsel %vm433_vm5, %v1658_v9, %v2486_v24  ;;  %v1395_v56 = vsel %vm263_vm3, %v3810_v30, %v1394_v7  ;;  %v1809_v30 = vsel %vm263_vm3, 0.0, %v1808_v58  ;;  %v4819_v7 = vld [vmem:[#allocation32_spill] sm:$0xff] }
 0x1a1   : > { %v4218_v12 = vsel %vm435_vm6, %v1659_v17, %v2541_v60  ;;  %v4221_v61 = vsel %vm435_vm6, %v1666_v39, %v2542_v48  ;;  %2664 = vrot.lane.b32.xlu2 %v4817_v62, %s2845_s17  ;;  %v4239_v48 = vsel %vm263_vm3, 0.0, %v1408_v21  ;;  %v1339_v60 = vsel %vm263_vm3, %v3722_v5, %v1338_v35 }
 0x1a2   : > { %2674 = vrot.lane.b32.xlu0 %v4818_v13, %s2846_s19  ;;  %v2703_v41 = vpack.i.bf16 %v4239_v48, %v4225_v20  ;;  %v4252_v53 = vperm.slane %v1339_v60, %v2994_v52  ;;  %v4257_v5 = vperm.slane %v1395_v56, %v2994_v52  ;;  %v1349_v35 = vsel %vm263_vm3, 0.0, %v1348_v32 }
 0x1a3   : > { %v1991_v57 = vsel %vm263_vm3, %v1990_v29, %v4819_v7  ;;  %v2678_v50 = vpack.i.bf16 %v1809_v30, %v1753_v36  ;;  %v2683_v58 = vpack.i.bf16 %v1405_v42, %v1349_v35  ;;  %v1959_v31 = vsel %vm263_vm3, 0.0, %v1958_v2 }
 0x1a4   : > { %v1354_v1 = vrot.slane %v4252_v53, 4  ;;  %v2713_v54 = vpack.i.bf16 %v4257_v5, %v4252_v53  ;;  %v1410_v11 = vrot.slane %v4257_v5, 4  ;;  %v4276_v46 = vperm.slane %v1991_v57, %v2994_v52 }
 0x1a5   : > { %v1350_v9 = vrot.slane %v3866_v14, 4  ;;  %v2016_v39 = vrot.slane %v3880_v0, 4  ;;  %v1407_v32 = vsel %vm263_vm3, 0.0, %v1406_v16  ;;  %v1756_v62 = vrot.slane %v3926_v8, 4  ;;  %v4820_v0 = vld [vmem:[#allocation33_spill] sm:$0xff]  ;;  %v4821_v16 = vld [vmem:[#allocation34_spill] sm:$0xff] }
 0x1a6   : > { %v4270_v24 = vsel %vm263_vm3, 0.0, %v1354_v1  ;;  %v4273_v22 = vsel %vm263_vm3, 0.0, %v1410_v11  ;;  %v2014_v21 = vrot.slane %v4276_v46, 4  ;;  %v2467_v56 = vunpack.i.h.bf16 %v4820_v0 }
 0x1a7   : > { %v2723_v40 = vpack.i.bf16 %v4273_v22, %v4270_v24  ;;  %2023 = vrot.lane.b32.xlu1 %v1959_v31, %s2844_s11  ;;  %v1351_v17 = vsel %vm263_vm3, 0.0, %v1350_v9  ;;  %v2017_v14 = vsel %vm263_vm3, 0.0, %v2016_v39  ;;  %v2466_v29 = vunpack.i.l.bf16 %v4820_v0 }
 0x1a8   : > { %v2015_v13 = vsel %vm263_vm3, 0.0, %v2014_v21  ;;  %v2693_v60 = vpack.i.bf16 %v1407_v32, %v1351_v17  ;;  %v2512_v36 = vunpack.i.h.bf16 %v4045_v45  ;;  %v2507_v8 = vunpack.i.h.bf16 %v4055_v59  ;;  %v4822_v17 = vld [vmem:[#allocation19_spill] sm:$0xff] }
 0x1a9   : > { %2679 = vrot.lane.b32.xlu2 %v2678_v50, %s2844_s11  ;;  %v2506_v30 = vunpack.i.l.bf16 %v4055_v59  ;;  %v2511_v35 = vunpack.i.l.bf16 %v4045_v45  ;;  %v1757_v3 = vsel %vm263_vm3, 0.0, %v1756_v62  ;;  %v1813_v42 = vsel %vm263_vm3, 0.0, %v1812_v18 }
 0x1aa   : > { %2684 = vrot.lane.b32.xlu0 %v2683_v58, %s2844_s11  ;;  %v2018_v1 = vrot.slane %v3944_v55, 4  ;;  %v449_v7 = vsel %vm439_vm8, %v4069_v28, %v2507_v8  ;;  %v2698_v45 = vpack.i.bf16 %v1813_v42, %v1757_v3  ;;  %v2545_v55 = vpop.permute.xlu0 %2544  ;;  %v4320_v58 = vpop.permute.xlu2 %2574  ;;  %v1758_v28 = vrot.slane %v3949_v10, 4 }
 0x1ab   : > { %v440_v2 = vsel %vm439_vm8, %v4066_v33, %v2506_v30  ;;  %v450_v59 = vsel %vm441_vm9, %v449_v7, %v2467_v56  ;;  %v1814_v31 = vrot.slane %v3955_v44, 4  ;;  %v1960_v9 = vrot.slane %v3877_v23, 4 }
 0x1ac   : > { %v442_v57 = vsel %vm441_vm9, %v440_v2, %v2466_v29  ;;  %v4318_v50 = vsel %vm443_vm10, %v450_v59, %v2512_v36  ;;  %v2019_v33 = vsel %vm263_vm3, 0.0, %v2018_v1  ;;  %v2477_v21 = vunpack.i.h.bf16 %v4821_v16  ;;  %v4825_v59 = vld [vmem:[#allocation39_spill] sm:$0xff] }
 0x1ad   : > { %v4315_v11 = vsel %vm443_vm10, %v442_v57, %v2511_v35  ;;  %v2476_v39 = vunpack.i.l.bf16 %v4821_v16  ;;  %v2527_v32 = vunpack.i.h.bf16 %v4822_v17  ;;  %v1759_v10 = vsel %vm263_vm3, 0.0, %v1758_v28  ;;  %v4828_v16 = vld [vmem:[#allocation9_spill] sm:$0xff] }
 0x1ae   : > { %v1815_v44 = vsel %vm263_vm3, 0.0, %v1814_v31  ;;  %v2532_v23 = vunpack.i.h.bf16 %v4153_v34  ;;  %v1058_v18 = vsel %vm437_vm7, %v4134_v51, %v2477_v21  ;;  %v2531_v0 = vunpack.i.l.bf16 %v4153_v34 }
 0x1af   : > { %2694 = vrot.lane.b32.xlu1 %v2693_v60, %s2845_s17  ;;  %v1051_v60 = vsel %vm437_vm7, %v4137_v63, %v2476_v39  ;;  %v1961_v56 = vsel %vm263_vm3, 0.0, %v1960_v9  ;;  %v1059_v36 = vsel %vm439_vm8, %v1058_v18, %v2527_v32  ;;  %v1963_v8 = vsel %vm263_vm3, 0.0, %v1962_v47  ;;  %v4831_v32 = vld [vmem:[#allocation11_spill] sm:$0xff] }
 0x1b0   : > { %v2708_v30 = vpack.i.bf16 %v1815_v44, %v1759_v10  ;;  %v2013_v1 = vperm.slane %v4215_v15, %v2994_v52  ;;  %v2492_v52 = vunpack.i.h.bf16 %v4825_v59  ;;  %v2491_v15 = vunpack.i.l.bf16 %v4825_v59 }
 0x1b1   : > { %2051 = vrot.lane.b32.xlu2 %v2015_v13, %s2844_s11  ;;  %v2526_v13 = vunpack.i.l.bf16 %v4822_v17  ;;  %v2547_v28 = vunpack.i.h.bf16 %v2545_v55  ;;  %v2546_v31 = vunpack.i.l.bf16 %v2545_v55  ;;  %v4830_v17 = vld [vmem:[#allocation12_spill] sm:$0xff]  ;;  %v2552_v18 = vunpack.i.h.bf16 %v4290_v6  ;;  %s2779_s11 = sshra.s32 %s2201_s9, 4  ;;  %s2780_s11 = int_to_ptr.hbm [resolvable:$true] %s2779_s11 }
 0x1b2   : > { %2059 = vrot.lane.b32.xlu0 %v2017_v14, %s2845_s17  ;;  %v4353_v42 = vpop.permute.xlu0 %2559  ;;  %v4358_v63 = vpop.permute.xlu2 %2589  ;;  %v2020_v9 = vrot.slane %v2013_v1, 4  ;;  %v1661_v20 = vsel %vm437_vm7, %v4218_v12, %v2491_v15  ;;  %v1668_v48 = vsel %vm437_vm7, %v4221_v61, %v2492_v52  ;;  %v4832_v49 = vpack.i.bf16 %v4830_v17, %v4831_v32  ;;  %s2781_s16 = scalar_lea.hbm %s2780_s11, 16  ;;  %p2786_p0 = scmp.lt.s32.totalorder %s2780_s11, %s4703_s3 }
 0x1b3   : > { %v1052_v29 = vsel %vm439_vm8, %v1051_v60, %v2526_v13  ;;  %v4368_v2 = vpop.permute.xlu1 %2554  ;;  %v4394_v53 = vsel %vm439_vm8, %v1668_v48, %v2547_v28  ;;  %p2782_p6 = scmp.ne.s32.totalorder %s2780_s11, %s2781_s16 }
 0x1b4   : > { %v2021_v12 = vsel %vm263_vm3, 0.0, %v2020_v9  ;;  %v4833_v9 = vld [vmem:[#allocation37_spill] sm:$0xff] }
 0x1b5   : > { %p2783_p9 = pnand %p2782_p6, %p2919_p11 }
 0x1b7   : > { %2067 = vrot.lane.b32.xlu1 %v2019_v33, %s2847_s20  ;;  %p2784_p13 = pneg %p2783_p9 }
 0x1b9   : > { %2689 = vrot.lane.b32.xlu2 %v2688_v37, %s2845_s17  ;;  %v4824_v37 = vld [vmem:[#allocation35_spill] sm:$0xff] }
 0x1ba   : > { %2699 = vrot.lane.b32.xlu0 %v2698_v45, %s2847_s20  ;;  %v2482_v62 = vunpack.i.h.bf16 %v4824_v37  ;;  %v2481_v14 = vunpack.i.l.bf16 %v4824_v37  ;;  %v4826_v45 = vld [vmem:[#allocation42_spill] sm:$0xff] }
 0x1bb   : > { %v1964_v33 = vrot.slane %v4826_v45, 4  ;;  %v2565_v55 = vpop.permute.xlu1 %2564 }
 0x1bc   : > { %v1053_v35 = vsel %vm441_vm9, %v1052_v29, %v2481_v14  ;;  %v1060_v3 = vsel %vm441_vm9, %v1059_v36, %v2482_v62  ;;  %v2566_v29 = vunpack.i.l.bf16 %v2565_v55 }
 0x1bd   : > { %v4361_v51 = vsel %vm443_vm10, %v1053_v35, %v2531_v0  ;;  %v4364_v34 = vsel %vm443_vm10, %v1060_v3, %v2532_v23  ;;  %v1965_v5 = vsel %vm263_vm3, 0.0, %v1964_v33  ;;  %v2551_v0 = vunpack.i.l.bf16 %v4290_v6 }
 0x1bf   : > { %2709 = vrot.lane.b32.xlu1 %v2708_v30, %s2846_s19  ;;  %v4370_v7 = vpop.permute.xlu0 %2569 }
 0x1c0   : > { %v2572_v30 = vunpack.i.h.bf16 %v4370_v7  ;;  %v2571_v35 = vunpack.i.l.bf16 %v4370_v7  ;;  %v4835_v7 = vld [vmem:[#allocation40_spill] sm:$0xff] }
 0x1c1   : > { %2031 = vrot.lane.b32.xlu2 %v1961_v56, %s2845_s17  ;;  %v2567_v56 = vunpack.i.h.bf16 %v2565_v55 }
 0x1c2   : > { %2039 = vrot.lane.b32.xlu0 %v1963_v8, %s2847_s20 }
 0x1c3   : > { %v4420_v62 = vpop.permute.xlu1 %2579 }
 0x1c7   : > { %2714 = vrot.lane.b32.xlu1 %v2713_v54, %s2841_s8  ;;  %v4827_v54 = vld [vmem:[#allocation10_spill] sm:$0xff]  ;;  %v4404_v61 = vpop.permute.xlu0 %2584 }
 0x1c8   : > { %v4381_v57 = vpop.permute.xlu2 %2599  ;;  %v4829_v21 = vpack.i.bf16 %v4827_v54, %v4828_v16 }
 0x1c9   : > { %2704 = vrot.lane.b32.xlu2 %v2703_v41, %s2847_s20  ;;  %v4391_v41 = vsel %vm439_vm8, %v1661_v20, %v2546_v31  ;;  %v4834_v20 = vld [vmem:[#allocation36_spill] sm:$0xff]  ;;  %s2785_s20 = scalar_lea.hbm %s4703_s3, 32 }
 0x1ca   : > { %2071 = vrot.lane.b32.xlu0 %v2013_v1, %s2841_s8  ;;  %p2787_p1 = scmp.lt.s32.totalorder %s2785_s20, %s2781_s16 }
 0x1cc   : > { %p2788_p3 = por %p2787_p1, %p2786_p0 }
 0x1ce   : > { %p2789_p4 = pnand %p2788_p3, %p2784_p13 }
 0x1cf   : > { %2075 = vrot.lane.b32.xlu1 %v2021_v12, %s2846_s19 }
 0x1d0   : > { %v4406_v39 = vpop.permute.xlu2 %2063 }
 0x1d1   : > { %2719 = vrot.lane.b32.xlu2 %v4829_v21, %s2841_s8  ;;  %v4836_v21 = vld [vmem:[#allocation38_spill] sm:$0xff]  ;;  %s2198_s8 = sshll.u32 %s190_s7, 4  ;;  %s2199_s8 = int_to_ptr.vmem [resolvable:$true] %s2198_s8 }
 0x1d2   : > { %2047 = vrot.lane.b32.xlu0 %v1965_v5, %s2846_s19 }
 0x1d4   : > { %v4416_v47 = vpop.permute.xlu0 %2594 }
 0x1d8   : > { %v4418_v37 = vpop.permute.xlu2 %2614 }
 0x1d9   : > { %2724 = vrot.lane.b32.xlu2 %v2723_v40, %s2846_s19 }
 0x1da   : > { %2729 = vrot.lane.b32.xlu0 %v4832_v49, %s2846_s19 }
 0x1df   : > { %v4426_v44 = vpop.permute.xlu1 %2055 }
 0x1e0   : > { %v4422_v13 = vpop.permute.xlu2 %2043  ;;  %v4424_v10 = vpop.permute.xlu0 %2027 }
 0x1e8   : > { %v4430_v24 = vpop.permute.xlu0 %2609 }
 0x1e9   : > { %v4432_v22 = vpop.permute.xlu1 %2604 }
 0x1eb   : > { %v4428_v14 = vpop.permute.xlu2 %2629 }
 0x1f0   : > { %v2625_v23 = vpop.permute.xlu0 %2624 }
 0x1f1   : > { %v4434_v60 = vpop.permute.xlu1 %2035  ;;  %v2627_v28 = vunpack.i.h.bf16 %v2625_v23  ;;  %v2626_v31 = vunpack.i.l.bf16 %v2625_v23 }
 0x1f3   : > { %v2645_v40 = vpop.permute.xlu2 %2644 }
 0x1f4   : > { %v2647_v52 = vunpack.i.h.bf16 %v2645_v40  ;;  %v2646_v15 = vunpack.i.l.bf16 %v2645_v40 }
 0x1f8   : > { %v2640_v8 = vpop.permute.xlu0 %2639 }
 0x1f9   : > { %v2642_v3 = vunpack.i.h.bf16 %v2640_v8  ;;  %v2641_v1 = vunpack.i.l.bf16 %v2640_v8  ;;  %v2620_v59 = vpop.permute.xlu1 %2619 }
 0x1fa   : > { %v2622_v45 = vunpack.i.h.bf16 %v2620_v59  ;;  %v2621_v33 = vunpack.i.l.bf16 %v2620_v59 }
 0x1fb   : > { %v2665_v36 = vpop.permute.xlu2 %2664  ;;  %v865_v6 = vsel %vm431_vm4, %v4833_v9, %v2642_v3  ;;  %v858_v48 = vsel %vm431_vm4, %v4834_v20, %v2641_v1  ;;  %v2581_v1 = vunpack.i.l.bf16 %v4420_v62 }
 0x1fc   : > { %v859_v5 = vsel %vm433_vm5, %v858_v48, %v2566_v29  ;;  %v866_v54 = vsel %vm433_vm5, %v865_v6, %v2567_v56  ;;  %v659_v16 = vsel %vm431_vm4, %v4835_v7, %v2622_v45  ;;  %v652_v12 = vsel %vm431_vm4, %v4836_v21, %v2621_v33 }
 0x1fd   : > { %v653_v55 = vsel %vm433_vm5, %v652_v12, %v2551_v0  ;;  %v660_v17 = vsel %vm433_vm5, %v659_v16, %v2552_v18  ;;  %v860_v32 = vsel %vm435_vm6, %v859_v5, %v2646_v15  ;;  %v867_v49 = vsel %vm435_vm6, %v866_v54, %v2647_v52 }
 0x1fe   : > { %v4455_v40 = vsel %vm435_vm6, %v653_v55, %v2626_v31  ;;  %v4458_v23 = vsel %vm435_vm6, %v660_v17, %v2627_v28  ;;  %v861_v56 = vsel %vm437_vm7, %v860_v32, %v2571_v35  ;;  %v868_v29 = vsel %vm437_vm7, %v867_v49, %v2572_v30 }
 0x1ff   : > { %v2582_v18 = vunpack.i.h.bf16 %v4420_v62  ;;  %v2587_v15 = vunpack.i.h.bf16 %v4404_v61  ;;  %v2586_v45 = vunpack.i.l.bf16 %v4404_v61  ;;  %v2667_v30 = vunpack.i.h.bf16 %v2665_v36 }
 0x200   : > { %v2666_v31 = vunpack.i.l.bf16 %v2665_v36  ;;  %v2597_v17 = vunpack.i.h.bf16 %v4416_v47  ;;  %v2596_v32 = vunpack.i.l.bf16 %v4416_v47 }
 0x201   : > { %v4464_v0 = vpop.permute.xlu1 %2634 }
 0x203   : > { %v2680_v8 = vpop.permute.xlu2 %2679 }
 0x204   : > { %v4462_v3 = vpop.permute.xlu0 %2654  ;;  %v2682_v20 = vunpack.i.h.bf16 %v2680_v8  ;;  %v2681_v48 = vunpack.i.l.bf16 %v2680_v8 }
 0x206   : > { %v1872_v55 = vsel %vm431_vm4, %v4168_v4, %v2681_v48 }
 0x209   : > { %v2650_v28 = vpop.permute.xlu1 %2649 }
 0x20a   : > { %v2652_v9 = vunpack.i.h.bf16 %v2650_v28  ;;  %v2651_v6 = vunpack.i.l.bf16 %v2650_v28 }
 0x20b   : > { %v4468_v59 = vpop.permute.xlu2 %2051 }
 0x20c   : > { %v2660_v52 = vpop.permute.xlu0 %2659  ;;  %v4479_v61 = vsel %vm439_vm8, %v861_v56, %v2651_v6  ;;  %v4482_v16 = vsel %vm439_vm8, %v868_v29, %v2652_v9 }
 0x20d   : > { %v2662_v33 = vunpack.i.h.bf16 %v2660_v52  ;;  %v2661_v35 = vunpack.i.l.bf16 %v2660_v52  ;;  %v2606_v52 = vunpack.i.l.bf16 %v4432_v22 }
 0x20f   : > { %v1269_v5 = vsel %vm431_vm4, %v4095_v25, %v2662_v33  ;;  %v1262_v62 = vsel %vm431_vm4, %v4087_v26, %v2661_v35  ;;  %v1879_v26 = vsel %vm431_vm4, %v4181_v19, %v2682_v20  ;;  %v1873_v19 = vsel %vm433_vm5, %v1872_v55, %v2596_v32 }
 0x210   : > { %v1263_v54 = vsel %vm433_vm5, %v1262_v62, %v2581_v1  ;;  %v1270_v7 = vsel %vm433_vm5, %v1269_v5, %v2582_v18  ;;  %v2607_v1 = vunpack.i.h.bf16 %v4432_v22  ;;  %v2611_v55 = vunpack.i.l.bf16 %v4430_v24 }
 0x211   : > { %v1264_v36 = vsel %vm435_vm6, %v1263_v54, %v2666_v31  ;;  %v1271_v21 = vsel %vm435_vm6, %v1270_v7, %v2667_v30  ;;  %v4500_v18 = vpop.permute.xlu1 %2669  ;;  %v2556_v32 = vunpack.i.l.bf16 %v4368_v2 }
 0x212   : > { %v4487_v12 = vsel %vm437_vm7, %v1264_v36, %v2586_v45  ;;  %v4490_v25 = vsel %vm437_vm7, %v1271_v21, %v2587_v15  ;;  %v1880_v15 = vsel %vm433_vm5, %v1879_v26, %v2597_v17  ;;  %v2562_v36 = vunpack.i.h.bf16 %v4353_v42 }
 0x213   : > { %v2690_v49 = vpop.permute.xlu2 %2689 }
 0x214   : > { %v4498_v56 = vpop.permute.xlu0 %2674  ;;  %v2692_v29 = vunpack.i.h.bf16 %v2690_v49  ;;  %v2691_v8 = vunpack.i.l.bf16 %v2690_v49 }
 0x216   : > { %v1874_v4 = vsel %vm435_vm6, %v1873_v19, %v2691_v8  ;;  %v1881_v45 = vsel %vm435_vm6, %v1880_v15, %v2692_v29  ;;  %v2632_v8 = vunpack.i.h.bf16 %v4428_v14  ;;  %v2561_v19 = vunpack.i.l.bf16 %v4353_v42 }
 0x217   : > { %v1875_v47 = vsel %vm437_vm7, %v1874_v4, %v2606_v52  ;;  %v1882_v33 = vsel %vm437_vm7, %v1881_v45, %v2607_v1  ;;  %v2631_v1 = vunpack.i.l.bf16 %v4428_v14  ;;  %v655_v15 = vsel %vm437_vm7, %v4455_v40, %v2556_v32 }
 0x218   : > { %v2636_v45 = vunpack.i.l.bf16 %v4464_v0  ;;  %v2576_v40 = vunpack.i.l.bf16 %v4320_v58  ;;  %v2577_v32 = vunpack.i.h.bf16 %v4320_v58  ;;  %v2101_v58 = vrot.slane %v4364_v34, 4 }
 0x219   : > { %v2024_v28 = vpop.permute.xlu1 %2023  ;;  %v656_v14 = vsel %vm439_vm8, %v655_v15, %v2631_v1 }
 0x21a   : > { %v2078_v31 = vsel %vm431_vm4, %v4236_v27, %v2024_v28  ;;  %v2602_v27 = vunpack.i.h.bf16 %v4381_v57  ;;  %v2637_v28 = vunpack.i.h.bf16 %v4464_v0  ;;  %v657_v42 = vsel %vm441_vm9, %v656_v14, %v2561_v19 }
 0x21b   : > { %v2032_v30 = vpop.permute.xlu2 %2031  ;;  %v2079_v22 = vsel %vm433_vm5, %v2078_v31, %v4424_v10  ;;  %v2601_v10 = vunpack.i.l.bf16 %v4381_v57 }
 0x21c   : > { %v2685_v35 = vpop.permute.xlu0 %2684  ;;  %v2080_v20 = vsel %vm435_vm6, %v2079_v22, %v2032_v30  ;;  %v2672_v30 = vunpack.i.h.bf16 %v4500_v18 }
 0x21d   : > { %v2687_v9 = vunpack.i.h.bf16 %v2685_v35  ;;  %v2686_v6 = vunpack.i.l.bf16 %v2685_v35  ;;  %v4517_v48 = vsel %vm437_vm7, %v2080_v20, %v4434_v60  ;;  %v2612_v60 = vunpack.i.h.bf16 %v4430_v24 }
 0x21e   : > { %v2591_v20 = vunpack.i.l.bf16 %v4358_v63 }
 0x21f   : > { %v1475_v5 = vsel %vm431_vm4, %v4197_v43, %v2687_v9  ;;  %v1468_v62 = vsel %vm431_vm4, %v4193_v38, %v2686_v6  ;;  %v2557_v38 = vunpack.i.h.bf16 %v4368_v2  ;;  %v2671_v2 = vunpack.i.l.bf16 %v4500_v18 }
 0x220   : > { %v1469_v43 = vsel %vm433_vm5, %v1468_v62, %v2601_v10  ;;  %v1476_v17 = vsel %vm433_vm5, %v1475_v5, %v2602_v27  ;;  %v2617_v5 = vunpack.i.h.bf16 %v4418_v37  ;;  %v2616_v62 = vunpack.i.l.bf16 %v4418_v37 }
 0x221   : > { %v2695_v7 = vpop.permute.xlu1 %2694  ;;  %v662_v4 = vsel %vm437_vm7, %v4458_v23, %v2557_v38  ;;  %v1266_v0 = vsel %vm439_vm8, %v4487_v12, %v2671_v2  ;;  %v658_v10 = vsel %vm443_vm10, %v657_v42, %v2636_v45  ;;  %v2592_v37 = vunpack.i.h.bf16 %v4358_v63 }
 0x222   : > { %v2697_v21 = vunpack.i.h.bf16 %v2695_v7  ;;  %v2696_v26 = vunpack.i.l.bf16 %v2695_v7  ;;  %v663_v35 = vsel %vm439_vm8, %v662_v4, %v2632_v8  ;;  %v1273_v7 = vsel %vm439_vm8, %v4490_v25, %v2672_v30 }
 0x223   : > { %v4534_v49 = vpop.permute.xlu2 %2704  ;;  %v664_v22 = vsel %vm441_vm9, %v663_v35, %v2562_v36  ;;  %v2100_v63 = vrot.slane %v4361_v51, 4  ;;  %v2657_v8 = vunpack.i.h.bf16 %v4462_v3 }
 0x224   : > { %v4523_v54 = vpop.permute.xlu0 %2059  ;;  %v1470_v57 = vsel %vm435_vm6, %v1469_v43, %v2696_v26  ;;  %v1477_v29 = vsel %vm435_vm6, %v1476_v17, %v2697_v21  ;;  %v2094_v21 = vrot.slane %v658_v10, 4  ;;  %v665_v26 = vsel %vm443_vm10, %v664_v22, %v2637_v28 }
 0x225   : > { %v4541_v24 = vsel %vm437_vm7, %v1470_v57, %v2611_v55  ;;  %v4544_v52 = vsel %vm437_vm7, %v1477_v29, %v2612_v60  ;;  %v2656_v60 = vunpack.i.l.bf16 %v4462_v3  ;;  %v1274_v43 = vsel %vm441_vm9, %v1273_v7, %v2592_v37  ;;  %v2126_v3 = vld [vmem:[%s4702_s2] sm:$0xff] }
 0x226   : > { %v4586_v25 = vsel %vm2116_vm11, %v4315_v11, %v2094_v21  ;;  %v863_v17 = vsel %vm441_vm9, %v4479_v61, %v2576_v40  ;;  %v2707_v34 = vunpack.i.h.bf16 %v4534_v49  ;;  %v2706_v4 = vunpack.i.l.bf16 %v4534_v49 }
 0x227   : > { %v864_v29 = vsel %vm443_vm10, %v863_v17, %v2656_v60  ;;  %v2677_v40 = vunpack.i.h.bf16 %v4498_v56 }
 0x228   : > { %v4602_v19 = vsel %vm2116_vm11, %v864_v29, %v2100_v63  ;;  %v1472_v42 = vsel %vm439_vm8, %v4541_v24, %v2706_v4 }
 0x229   : > { %v4560_v23 = vpop.permute.xlu1 %2067 }
 0x22b   : > { %v4582_v55 = vpop.permute.xlu2 %2719 }
 0x22c   : > { %v2700_v31 = vpop.permute.xlu0 %2699  ;;  %v2721_v37 = vunpack.i.l.bf16 %v4582_v55 }
 0x22d   : > { %v2702_v9 = vunpack.i.h.bf16 %v2700_v31  ;;  %v2701_v6 = vunpack.i.l.bf16 %v2700_v31 }
 0x22e   : > { %v1663_v63 = vsel %vm441_vm9, %v4391_v41, %v2721_v37  ;;  %v2125_v41 = vld [vmem:[%s4701_s1] sm:$0xff] }
 0x22f   : > { %v1876_v18 = vsel %vm439_vm8, %v1875_v47, %v2701_v6  ;;  %v1883_v27 = vsel %vm439_vm8, %v1882_v33, %v2702_v9  ;;  %v1267_v47 = vsel %vm441_vm9, %v1266_v0, %v2591_v20  ;;  %v2095_v33 = vrot.slane %v665_v26, 4 }
 0x230   : > { %v4573_v36 = vsel %vm441_vm9, %v1876_v18, %v2616_v62  ;;  %v4578_v12 = vsel %vm441_vm9, %v1883_v27, %v2617_v5 }
 0x231   : > { %v4594_v38 = vsel %vm2116_vm11, %v4318_v50, %v2095_v33  ;;  %v2710_v1 = vpop.permute.xlu1 %2709  ;;  %v870_v50 = vsel %vm441_vm9, %v4482_v16, %v2577_v32 }
 0x232   : > { %v871_v61 = vsel %vm443_vm10, %v870_v50, %v2657_v8  ;;  %v2712_v21 = vunpack.i.h.bf16 %v2710_v1  ;;  %v2711_v26 = vunpack.i.l.bf16 %v2710_v1 }
 0x233   : > { %v2120_v2 = vsel %vm2116_vm11, %v871_v61, %v2101_v58  ;;  %v2725_v15 = vpop.permute.xlu2 %2724 }
 0x234   : > { %v2040_v57 = vpop.permute.xlu0 %2039  ;;  %v2727_v30 = vunpack.i.h.bf16 %v2725_v15  ;;  %v2726_v31 = vunpack.i.l.bf16 %v2725_v15  ;;  %v1885_v33 = vsel %vm443_vm10, %v4578_v12, %v2712_v21 }
 0x235   : > { %v2082_v11 = vsel %vm439_vm8, %v4517_v48, %v2040_v57  ;;  %v2848_v48 = vmov 0   ;;  %v2113_v29 = vrot.slane %v1885_v33, 4 }
 0x236   : > { %v2083_v51 = vsel %vm441_vm9, %v2082_v11, %v4422_v13  ;;  %2733 = vset.pattern.permute.xlu1 %v2848_v48  ;;  %2734 = vset.pattern.permute.xlu0 %v2848_v48  ;;  %v2085_v13 = vsel %vm431_vm4, %v4276_v46, %v4468_v59  ;;  %v1479_v46 = vsel %vm439_vm8, %v4544_v52, %v2707_v34 }
 0x237   : > { %2129 = vperm.xlu1 %2733, %v2126_v3   ;;  %v2086_v14 = vsel %vm433_vm5, %v2085_v13, %v4426_v44  ;;  %v2676_v44 = vunpack.i.l.bf16 %v4498_v56 }
 0x238   : > { %v2087_v59 = vsel %vm435_vm6, %v2086_v14, %v4523_v54  ;;  %v1275_v54 = vsel %vm443_vm10, %v1274_v43, %v2677_v40 }
 0x239   : > { %v2715_v45 = vpop.permute.xlu1 %2714  ;;  %v2088_v52 = vsel %vm437_vm7, %v2087_v59, %v4406_v39  ;;  %v1268_v5 = vsel %vm443_vm10, %v1267_v47, %v2676_v44  ;;  %v1878_v47 = vsel %vm443_vm10, %v4573_v36, %v2711_v26 }
 0x23a   : > { %v2717_v35 = vunpack.i.h.bf16 %v2715_v45  ;;  %v2716_v28 = vunpack.i.l.bf16 %v2715_v45  ;;  %v2089_v62 = vsel %vm439_vm8, %v2088_v52, %v4560_v23  ;;  %v2722_v23 = vunpack.i.h.bf16 %v4582_v55 }
 0x23b   : > { %v2112_v32 = vrot.slane %v1878_v47, 4 }
 0x23c   : > { %v2072_v16 = vpop.permute.xlu0 %2071  ;;  %v1473_v22 = vsel %vm441_vm9, %v1472_v42, %v2716_v28  ;;  %v1480_v49 = vsel %vm441_vm9, %v1479_v46, %v2717_v35  ;;  %v1670_v57 = vsel %vm441_vm9, %v4394_v53, %v2722_v23 }
 0x23d   : > { %v1474_v9 = vsel %vm443_vm10, %v1473_v22, %v2726_v31  ;;  %v1481_v6 = vsel %vm443_vm10, %v1480_v49, %v2727_v30  ;;  %v2090_v27 = vsel %vm441_vm9, %v2089_v62, %v2072_v16 }
 0x23e   : > { %v2106_v20 = vrot.slane %v1474_v9, 4  ;;  %v2107_v24 = vrot.slane %v1481_v6, 4 }
 0x240   : > { %v2121_v18 = vsel %vm2116_vm11, %v1268_v5, %v2106_v20  ;;  %v2122_v56 = vsel %vm2116_vm11, %v1275_v54, %v2107_v24 }
 0x241   : > { %v2076_v10 = vpop.permute.xlu1 %2075 }
 0x242   : > { %v2091_v39 = vsel %vm443_vm10, %v2090_v27, %v2076_v10 }
 0x243   : > { %2282 = vmatpush.msk.msra.mxu1 %vm2116_vm11, %v2091_v39 }
 0x244   : > { %v2048_v0 = vpop.permute.xlu0 %2047 }
 0x245   : > { %v2084_v7 = vsel %vm443_vm10, %v2083_v51, %v2048_v0 }
 0x246   : > { %2280 = vmatpush.msk.msra.mxu0 %vm2116_vm11, %v2084_v7 }
 0x24c   : > { %v2730_v60 = vpop.permute.xlu0 %2729 }
 0x24d   : > { %v2732_v43 = vunpack.i.h.bf16 %v2730_v60  ;;  %v2731_v17 = vunpack.i.l.bf16 %v2730_v60 }
 0x24f   : > { %v1664_v8 = vsel %vm443_vm10, %v1663_v63, %v2731_v17  ;;  %v1671_v55 = vsel %vm443_vm10, %v1670_v57, %v2732_v43 }
 0x250   : > { %v2123_v36 = vsel %vm2116_vm11, %v1664_v8, %v2112_v32  ;;  %v2124_v12 = vsel %vm2116_vm11, %v1671_v55, %v2113_v29 }
 0x251   : > { %2154 = vmatpush.msra.mxu0 %v2123_v36  ;;  %2174 = vmatpush.msra.mxu1 %v2124_v12 }
 0x253   : > { %2155 = vmatpush.msra.mxu0 %v2121_v18  ;;  %2175 = vmatpush.msra.mxu1 %v2122_v56 }
 0x255   : > { %2156 = vmatpush.msra.mxu0 %v4602_v19  ;;  %2176 = vmatpush.msra.mxu1 %v2120_v2 }
 0x257   : > { %2157 = vmatpush.msra.mxu0 %v4586_v25  ;;  %2177 = vmatpush.msra.mxu1 %v4594_v38 }
 0x258   : > { %2281 = vmatmul.msk.f32.vlgmr.msra.gmra.mxu0 %vm2132_vm12, %v2125_v41  ;;  %2283 = vmatmul.msk.f32.vlgmr.msra.gmra.mxu1 %vm2132_vm12, %v2125_v41 }
 0x2a9   : > { %v2130_v53 = vpop.permute.xlu1 %2129 }
 0x2d5   : > { %v2159_v11 = vpop.f32.mrf.mxu0  ;;  %v2179_v1 = vpop.f32.mrf.mxu1 }
 0x2d6   : > { %v2160_v19 = vadd.f32 %v2159_v11, %v2130_v53  ;;  %v2180_v25 = vadd.f32 %v2179_v1, %v2130_v53 }
 0x2d8   : > { %2182 = vst [vmem:[%s190_s7] sm:$0xff] %v2160_v19 }
 0x2d9   : > { %2183 = vst [vmem:[%s190_s7 + $0x8] sm:$0xff] %v2180_v25 }
 0x2da   : > { %2792 = shalt.err (!%p2789_p4)
}
 0x2db   : > { %2293 = dma.vmem_to_hbm [thread:$0]  (%p2919_p11), %s2199_s8, 256, %s2201_s9, %s2185_s10  }
 0x2dc PF: > { %s2212_s29 = sand.u32 1, %s2819_s12   ;;  %p4837_p7 = scmp.ge.s32.totalorder %s2831_s15, 2 }
 0x2dd   : > { %s2213_s26 = scalar_lea.sflag [#allocation5], %s2212_s29 }
 0x2de   : > { %p2300_p5 = pnand %p4837_p7, %p2923_p12 }
 0x2e0   : > { %p2301_p8 = pneg %p2300_p5 }
 0x2e2   : > { %2814 = dma.done.wait (%p2301_p8), %s2213_s26, 256  }
 0x2e3   : > { %2816 = vsyncadd (%p2301_p8), %s2213_s26, 4294967040  ;;  %p16_p10 = scmp.ge.s32.totalorder %s2894_s18, 4   ;;  %s4838_s12 = smov %s2823_s13 }
 0x2e4   : > { %s4839_s13 = smov %s2827_s14  ;;  %s4840_s14 = smov %s2906_s21 }
 0x2e5   : > { %s4841_s15 = smov %s2894_s18  ;;  %18 = sbr.rel (!%p16_p10) target bundleno = 5 (0x5), region = 77 }
 0x2ea   :  { %2219 = vsyncpa [#allocation4], 1 }
 0x2eb   :  { %2221 = vsyncpa [#allocation4 + $0x1], 1 }
 0x2ec   :  { %2222 = vsyncpa [#allocation5], 1 }
 0x2ed   :  { %2224 = vsyncpa [#allocation5 + $0x1], 1 }

</bundles_post_ra>
